<compile_context>
chip_gen: v7x
topology: tpu7x:2x2x1
jax: 0.10.0
libtpu: 0.0.40
codegen_flags: <defaults>
</compile_context>

<pallas_src>
import numpy as np
import jax
import jax.numpy as jnp
from jax.experimental import pallas as pl
from jax.experimental.pallas import tpu as pltpu


def graphsage_kernel(sel_ref, mask_ref, feats_ref, w_self_ref, w_neigh_ref,
                     w_cls_ref, embeds_ref, scores_ref):
    feats = feats_ref[...]                                    # [M_pad, F_pad] bf16 (resident)

    # Self selection and mean-neighbor aggregation as standard-layout MXU matmuls.
    self_f = jnp.dot(sel_ref[...], feats,
                     preferred_element_type=jnp.float32)      # [tN, F_pad] f32
    neigh_f = jnp.dot(mask_ref[...], feats,
                      preferred_element_type=jnp.float32)     # [tN, F_pad] f32

    # Encoder: W_enc @ cat([self, neigh]).T  ==  self @ Wself^T + neigh @ Wneigh^T
    # (two dots + f32 add: no concat copy, no padded weight gap).
    hidden = jnp.dot(self_f.astype(jnp.bfloat16), w_self_ref[...],
                     preferred_element_type=jnp.float32)      # [tN, E_pad] f32
    hidden = hidden + jnp.dot(neigh_f.astype(jnp.bfloat16), w_neigh_ref[...],
                              preferred_element_type=jnp.float32)
    embeds = jnp.maximum(hidden, 0.0)                         # ReLU, lane-dense [tN, E_pad]
    embeds_ref[...] = embeds

    # Classifier head: scores.t() directly in lane-dense [tN, C_pad] layout.
    scores_ref[...] = jnp.dot(embeds.astype(jnp.bfloat16), w_cls_ref[...],
                              preferred_element_type=jnp.float32)


def supervised_graphsage_forward(self_sel, neigh_mask, features, w_enc, w_cls,
                                 *, tile_n=128):
    """Returns (scores.t() [N, C], embeds [E, N]) matching the PyTorch module."""
    N, M = neigh_mask.shape
    F = features.shape[1]
    E = w_enc.shape[0]
    C = w_cls.shape[0]

    def rup(x, m):
        return (x + m - 1) // m * m

    N_pad = rup(N, tile_n)
    M_pad = rup(M, 128)
    F_pad = rup(F, 128)
    E_pad = rup(E, 128)
    C_pad = rup(C, 128)

    dt = jnp.bfloat16
    sel_p = jnp.zeros((N_pad, M_pad), dt).at[:N, :M].set(self_sel.astype(dt))
    mask_p = jnp.zeros((N_pad, M_pad), dt).at[:N, :M].set(neigh_mask.astype(dt))
    feat_p = jnp.zeros((M_pad, F_pad), dt).at[:M, :F].set(features.astype(dt))

    # Encoder weight split into pre-transposed self / neighbor halves.
    w_self_t = jnp.zeros((F_pad, E_pad), dt).at[:F, :E].set(w_enc[:, :F].T.astype(dt))
    w_neigh_t = jnp.zeros((F_pad, E_pad), dt).at[:F, :E].set(w_enc[:, F:].T.astype(dt))
    # Pre-transposed classifier weight.
    w_cls_t = jnp.zeros((E_pad, C_pad), dt).at[:E, :C].set(w_cls.T.astype(dt))

    grid = (N_pad // tile_n,)
    embeds_nd, scores_nd = pl.pallas_call(
        graphsage_kernel,
        out_shape=(
            jax.ShapeDtypeStruct((N_pad, E_pad), jnp.float32),
            jax.ShapeDtypeStruct((N_pad, C_pad), jnp.float32),
        ),
        grid=grid,
        in_specs=[
            pl.BlockSpec((tile_n, M_pad), lambda i: (i, 0)),     # self one-hot selector
            pl.BlockSpec((tile_n, M_pad), lambda i: (i, 0)),     # normalized neighbor mask
            pl.BlockSpec((M_pad, F_pad), lambda i: (0, 0)),      # feature table (resident)
            pl.BlockSpec((F_pad, E_pad), lambda i: (0, 0)),      # W_enc self-half ^T
            pl.BlockSpec((F_pad, E_pad), lambda i: (0, 0)),      # W_enc neigh-half ^T
            pl.BlockSpec((E_pad, C_pad), lambda i: (0, 0)),      # W_cls ^T
        ],
        out_specs=[
            pl.BlockSpec((tile_n, E_pad), lambda i: (i, 0)),     # embeds, lane-dense [N, E]
            pl.BlockSpec((tile_n, C_pad), lambda i: (i, 0)),     # scores.t(), lane-dense [N, C]
        ],
        compiler_params=pltpu.CompilerParams(
            dimension_semantics=("parallel",),
            vmem_limit_bytes=32 * 1024 * 1024),
    )(sel_p, mask_p, feat_p, w_self_t, w_neigh_t, w_cls_t)

    scores_t = scores_nd[:N, :C]          # == scores.t() in the PyTorch module
    embeds = embeds_nd[:N, :E].T          # [E, N] Encoder output layout (glue transpose)
    return scores_t, embeds


if __name__ == "__main__":
    # Small, module-consistent shapes (graph nodes M, features F, embed E, classes C, batch N).
    M = 300
    F = 32
    E = 32
    C = 7
    N = 200
    num_sample = 10   # Encoder default

    key = jax.random.PRNGKey(0)
    k_feat, k_enc, k_cls = jax.random.split(key, 3)

    # Node feature table (stands in for the nn.Embedding `features`).
    features = jax.random.normal(k_feat, (M, F), dtype=jnp.float32)

    # Xavier-uniform inits like init.xavier_uniform_.
    b_enc = float(np.sqrt(6.0 / (E + 2 * F)))
    w_enc = jax.random.uniform(k_enc, (E, 2 * F), jnp.float32, -b_enc, b_enc)   # Encoder.weight
    b_cls = float(np.sqrt(6.0 / (C + E)))
    w_cls = jax.random.uniform(k_cls, (C, E), jnp.float32, -b_cls, b_cls)       # SupervisedGraphSage.weight

    # Deterministic adjacency lists + MeanAggregator-style neighbor sampling:
    # neigh_mask row i = 1/deg over sampled neighbors; self_sel row i = one-hot(node i).
    rng = np.random.RandomState(0)
    adj_lists = {
        i: set(rng.choice(M, size=rng.randint(2, 8), replace=False).tolist()) - {i}
        for i in range(M)
    }
    nodes = np.arange(N)
    mask_np = np.zeros((N, M), dtype=np.float32)
    sel_np = np.zeros((N, M), dtype=np.float32)
    for row, node in enumerate(nodes):
        neighs = sorted(adj_lists[int(node)])
        if len(neighs) > num_sample:
            neighs = sorted(rng.choice(neighs, size=num_sample, replace=False).tolist())
        for j in neighs:
            mask_np[row, j] = 1.0
        mask_np[row] /= max(len(neighs), 1)   # mean aggregation
        sel_np[row, node] = 1.0               # replaces the duplicate self_feats gather
    neigh_mask = jnp.asarray(mask_np)
    self_sel = jnp.asarray(sel_np)

    scores_t, embeds = supervised_graphsage_forward(self_sel, neigh_mask,
                                                    features, w_enc, w_cls)
    scores_t, embeds = jax.block_until_ready((scores_t, embeds))

    # Reference of the PyTorch forward (numpy, f32 math on bf16-rounded operands
    # to mirror the kernel's operand precision).
    def _bf(x):
        return np.asarray(jnp.asarray(x).astype(jnp.bfloat16).astype(jnp.float32))

    feat_r, mask_r, sel_r = _bf(features), _bf(neigh_mask), _bf(self_sel)
    wenc_r, wcls_r = _bf(w_enc), _bf(w_cls)
    neigh_ref = mask_r @ feat_r
    self_ref = sel_r @ feat_r
    combined_ref = np.concatenate([self_ref, neigh_ref], axis=1)
    embeds_ref = np.maximum(wenc_r @ combined_ref.T, 0.0)      # [E, N]
    scores_t_ref = (wcls_r @ embeds_ref).T                      # [N, C]

    assert scores_t.shape == (N, C) and embeds.shape == (E, N)
    np.testing.assert_allclose(np.asarray(embeds), embeds_ref, rtol=5e-2, atol=5e-2)
    np.testing.assert_allclose(np.asarray(scores_t), scores_t_ref, rtol=5e-2, atol=5e-2)
    print("KERNEL_OK")
</pallas_src>

<mosaic_0001>
module attributes {stable_mosaic.version = 11 : i64} {
  func.func @graphsage_kernel(%arg0: i32, %arg1: memref<128x384xbf16, #tpu.memory_space<vmem>>, %arg2: memref<128x384xbf16, #tpu.memory_space<vmem>>, %arg3: memref<384x128xbf16, #tpu.memory_space<vmem>>, %arg4: memref<128x128xbf16, #tpu.memory_space<vmem>>, %arg5: memref<128x128xbf16, #tpu.memory_space<vmem>>, %arg6: memref<128x128xbf16, #tpu.memory_space<vmem>>, %arg7: memref<128x128xf32, #tpu.memory_space<vmem>>, %arg8: memref<128x128xf32, #tpu.memory_space<vmem>>) attributes {dimension_semantics = [#tpu.dimension_semantics<parallel>], iteration_bounds = array<i64: 2>, scalar_prefetch = 0 : i64, scratch_operands = 0 : i64, tpu.core_type = #tpu.core_type<tc>, window_params = [{transform_indices = @transform_0, window_bounds = array<i64: 128, 384>}, {transform_indices = @transform_1, window_bounds = array<i64: 128, 384>}, {pipeline_mode = #tpu.pipeline_mode<synchronous>, transform_indices = @transform_2, window_bounds = array<i64: 384, 128>}, {pipeline_mode = #tpu.pipeline_mode<synchronous>, transform_indices = @transform_3, window_bounds = array<i64: 128, 128>}, {pipeline_mode = #tpu.pipeline_mode<synchronous>, transform_indices = @transform_4, window_bounds = array<i64: 128, 128>}, {pipeline_mode = #tpu.pipeline_mode<synchronous>, transform_indices = @transform_5, window_bounds = array<i64: 128, 128>}, {transform_indices = @transform_6, window_bounds = array<i64: 128, 128>}, {transform_indices = @transform_7, window_bounds = array<i64: 128, 128>}]} {
    %c0 = arith.constant 0 : index
    %c0_0 = arith.constant 0 : index
    %0 = vector.load %arg3[%c0, %c0_0] : memref<384x128xbf16, #tpu.memory_space<vmem>>, vector<384x128xbf16>
    %c0_1 = arith.constant 0 : index
    %c0_2 = arith.constant 0 : index
    %1 = vector.load %arg1[%c0_1, %c0_2] : memref<128x384xbf16, #tpu.memory_space<vmem>>, vector<128x384xbf16>
    %cst = arith.constant dense<0.000000e+00> : vector<128x128xf32>
    %2 = tpu.matmul %1, %0, %cst {dimension_numbers = #tpu.dot_dimension_numbers<[1], [0], [0], [1], [0, 0, 1, 1], [], []>} : vector<128x384xbf16>, vector<384x128xbf16>, vector<128x128xf32> -> vector<128x128xf32>
    %c0_3 = arith.constant 0 : index
    %c0_4 = arith.constant 0 : index
    %3 = vector.load %arg2[%c0_3, %c0_4] : memref<128x384xbf16, #tpu.memory_space<vmem>>, vector<128x384xbf16>
    %cst_5 = arith.constant dense<0.000000e+00> : vector<128x128xf32>
    %4 = tpu.matmul %3, %0, %cst_5 {dimension_numbers = #tpu.dot_dimension_numbers<[1], [0], [0], [1], [0, 0, 1, 1], [], []>} : vector<128x384xbf16>, vector<384x128xbf16>, vector<128x128xf32> -> vector<128x128xf32>
    %5 = arith.truncf %2 : vector<128x128xf32> to vector<128x128xbf16>
    %c0_6 = arith.constant 0 : index
    %c0_7 = arith.constant 0 : index
    %6 = vector.load %arg4[%c0_6, %c0_7] : memref<128x128xbf16, #tpu.memory_space<vmem>>, vector<128x128xbf16>
    %cst_8 = arith.constant dense<0.000000e+00> : vector<128x128xf32>
    %7 = tpu.matmul %5, %6, %cst_8 {dimension_numbers = #tpu.dot_dimension_numbers<[1], [0], [0], [1], [0, 0, 1, 1], [], []>} : vector<128x128xbf16>, vector<128x128xbf16>, vector<128x128xf32> -> vector<128x128xf32>
    %8 = arith.truncf %4 : vector<128x128xf32> to vector<128x128xbf16>
    %c0_9 = arith.constant 0 : index
    %c0_10 = arith.constant 0 : index
    %9 = vector.load %arg5[%c0_9, %c0_10] : memref<128x128xbf16, #tpu.memory_space<vmem>>, vector<128x128xbf16>
    %cst_11 = arith.constant dense<0.000000e+00> : vector<128x128xf32>
    %10 = tpu.matmul %8, %9, %cst_11 {dimension_numbers = #tpu.dot_dimension_numbers<[1], [0], [0], [1], [0, 0, 1, 1], [], []>} : vector<128x128xbf16>, vector<128x128xbf16>, vector<128x128xf32> -> vector<128x128xf32>
    %11 = arith.addf %7, %10 : vector<128x128xf32>
    %cst_12 = arith.constant 0.000000e+00 : f32
    %12 = vector.broadcast %cst_12 : f32 to vector<128x128xf32>
    %13 = arith.maximumf %11, %12 : vector<128x128xf32>
    %c0_13 = arith.constant 0 : index
    %c0_14 = arith.constant 0 : index
    %14 = vector.load %arg7[%c0_13, %c0_14] : memref<128x128xf32, #tpu.memory_space<vmem>>, vector<128x128xf32>
    tpu.vector_store %arg7[%c0_13, %c0_14], %13 {strides = array<i32>} : memref<128x128xf32, #tpu.memory_space<vmem>>, vector<128x128xf32>,
    %15 = arith.truncf %13 : vector<128x128xf32> to vector<128x128xbf16>
    %c0_15 = arith.constant 0 : index
    %c0_16 = arith.constant 0 : index
    %16 = vector.load %arg6[%c0_15, %c0_16] : memref<128x128xbf16, #tpu.memory_space<vmem>>, vector<128x128xbf16>
    %cst_17 = arith.constant dense<0.000000e+00> : vector<128x128xf32>
    %17 = tpu.matmul %15, %16, %cst_17 {dimension_numbers = #tpu.dot_dimension_numbers<[1], [0], [0], [1], [0, 0, 1, 1], [], []>} : vector<128x128xbf16>, vector<128x128xbf16>, vector<128x128xf32> -> vector<128x128xf32>
    %c0_18 = arith.constant 0 : index
    %c0_19 = arith.constant 0 : index
    %18 = vector.load %arg8[%c0_18, %c0_19] : memref<128x128xf32, #tpu.memory_space<vmem>>, vector<128x128xf32>
    tpu.vector_store %arg8[%c0_18, %c0_19], %17 {strides = array<i32>} : memref<128x128xf32, #tpu.memory_space<vmem>>, vector<128x128xf32>,
    return
  }
  func.func @transform_0(%arg0: i32) -> (i32, i32) {
    %c0_i32 = arith.constant 0 : i32
    %c0_i32_0 = arith.constant 0 : i32
    return %arg0, %c0_i32 : i32, i32
  }
  func.func @transform_1(%arg0: i32) -> (i32, i32) {
    %c0_i32 = arith.constant 0 : i32
    %c0_i32_0 = arith.constant 0 : i32
    return %arg0, %c0_i32 : i32, i32
  }
  func.func @transform_2(%arg0: i32) -> (i32, i32) {
    %c0_i32 = arith.constant 0 : i32
    %c0_i32_0 = arith.constant 0 : i32
    %c0_i32_1 = arith.constant 0 : i32
    return %c0_i32, %c0_i32_0 : i32, i32
  }
  func.func @transform_3(%arg0: i32) -> (i32, i32) {
    %c0_i32 = arith.constant 0 : i32
    %c0_i32_0 = arith.constant 0 : i32
    %c0_i32_1 = arith.constant 0 : i32
    return %c0_i32, %c0_i32_0 : i32, i32
  }
  func.func @transform_4(%arg0: i32) -> (i32, i32) {
    %c0_i32 = arith.constant 0 : i32
    %c0_i32_0 = arith.constant 0 : i32
    %c0_i32_1 = arith.constant 0 : i32
    return %c0_i32, %c0_i32_0 : i32, i32
  }
  func.func @transform_5(%arg0: i32) -> (i32, i32) {
    %c0_i32 = arith.constant 0 : i32
    %c0_i32_0 = arith.constant 0 : i32
    %c0_i32_1 = arith.constant 0 : i32
    return %c0_i32, %c0_i32_0 : i32, i32
  }
  func.func @transform_6(%arg0: i32) -> (i32, i32) {
    %c0_i32 = arith.constant 0 : i32
    %c0_i32_0 = arith.constant 0 : i32
    return %arg0, %c0_i32 : i32, i32
  }
  func.func @transform_7(%arg0: i32) -> (i32, i32) {
    %c0_i32 = arith.constant 0 : i32
    %c0_i32_0 = arith.constant 0 : i32
    return %arg0, %c0_i32 : i32, i32
  }
}

</mosaic_0001>

<bundles_post_ra>
// kernel: tpu_custom_call.1
= control target key start
LH: loop header
LB: loop body
LE: loop exit
PB: predicated region body
PF: predicated region fallthrough
CT: control target
= control target key end

     0   :  { %s3815_s0 = inlined_call_operand.hbm [shape: bf16[256,384], index: 0, kind: input, shape index: {}]   ;;  %s3816_s1 = inlined_call_operand.hbm [shape: bf16[256,384], index: 1, kind: input, shape index: {}]   ;;  %s3817_s2 = inlined_call_operand.hbm [shape: bf16[384,128], index: 2, kind: input, shape index: {}]   ;;  %s3818_s3 = inlined_call_operand.hbm [shape: bf16[128,128], index: 3, kind: input, shape index: {}]   ;;  %s3819_s4 = inlined_call_operand.hbm [shape: bf16[128,128], index: 4, kind: input, shape index: {}]   ;;  %s3820_s5 = inlined_call_operand.hbm [shape: bf16[128,128], index: 5, kind: input, shape index: {}]   ;;  %s3821_s6 = inlined_call_operand.hbm [shape: f32[256,128], index: 6, kind: output, shape index: {0}]   ;;  %s3822_s7 = inlined_call_operand.hbm [shape: f32[256,128], index: 7, kind: output, shape index: {1}]  }
   0x1   :  { %3828 = sst [smem:[#allocation24_spill]] %s3815_s0 }
   0x2   :  { %3829 = sst [smem:[#allocation25_spill]] %s3817_s2 }
   0x3   :  { %3830 = sst [smem:[#allocation26_spill]] %s3818_s3 }
   0x4   :  { %13 = vsyncpa [#allocation3], 0 }
   0x5   :  { %15 = vsyncpa [#allocation3 + $0x1], 0 }
   0x6   :  { %16 = vsyncpa [#allocation6], 0 }
   0x7   :  { %18 = vsyncpa [#allocation6 + $0x1], 0 }
   0x8   :  { %19 = vsyncpa [#allocation9], 0 }
   0x9   :  { %20 = vsyncpa [#allocation12], 0 }
   0xa   :  { %21 = vsyncpa [#allocation4], 0 }
   0xb   :  { %23 = vsyncpa [#allocation4 + $0x1], 0 }
   0xc   :  { %24 = vsyncpa [#allocation15], 0 }
   0xd   :  { %26 = vsyncpa [#allocation15 + $0x1], 0  ;;  %s3141_s24 = smov 0   ;;  %s3143_s25 = smov 0  }
   0xe   :  { %s3145_s26 = smov 0   ;;  %s3147_s27 = smov 0  }
   0xf LB: > { %s3162_s28 = sadd.s32 4294967295, %s3085_s27   ;;  %s2069_s29 = sadd.s32 4294967294, %s3085_s27   ;;  %s3085_s27 = sphi %s3147_s27, %s3858_s27   ;;  %s3081_s26 = sphi %s3145_s26, %s3857_s26   ;;  %s3077_s25 = sphi %s3143_s25, %s3856_s25   ;;  %s3073_s24 = sphi %s3141_s24, %s3855_s24  }
  0x10   : > { %p52_p0 = scmp.ne.s32.totalorder %s3077_s25, %s3073_s24  ;;  %p3823_p1 = scmp.eq.s32.totalorder %s3162_s28, 0 }
  0x11   : > { %p192_p3 = scmp.eq.s32.totalorder %s2069_s29, 1  ;;  %p2070_p5 = scmp.ge.s32.totalorder %s3085_s27, 1 }
  0x12   : > { %p3171_p4 = por %p3823_p1, %p52_p0  ;;  %p225_p7 = scmp.lt.s32.totalorder %s3085_s27, 3 }
  0x13   : > { %p3176_p6 = por %p192_p3, %p52_p0  ;;  %s3087_s10 = smov [#allocation7]  }
  0x14   : > { %s3831_s30 = scalar_select %p3171_p4, 1, 0 }
  0x15   : > { %s3832_s8 = scalar_select %p3176_p6, 1, 0 }
  0x16   : > { %p3181_p8 = pnand %p2070_p5, %p225_p7  ;;  %s237_s11 = sshll.u32 %s3087_s10, 4  ;;  %s3185_s11 = int_to_ptr.vmem [resolvable:$true] %s237_s11 }
  0x17   : > { %3833 = sst [smem:[#allocation23_spill]] %s3832_s8  ;;  %s3088_s13 = smov [#allocation8]  }
  0x18   : > { %s3834_s9 = scalar_select %p3181_p8, 1, 0 }
  0x19   : > { %p2608_p9 = pneg %p3181_p8  ;;  %s250_s14 = sshll.u32 %s3088_s13, 4  ;;  %s3196_s14 = int_to_ptr.vmem [resolvable:$true] %s250_s14 }
  0x1a   : > { %s3089_s15 = smov [#allocation10]   ;;  %s3836_s2 = sld [smem:[#allocation25_spill]] }
  0x1b   : > { %p3192_p11 = pnand %p2608_p9, %p3823_p1  ;;  %s3198_s16 = sshll.u32 %s3089_s15, 4  ;;  %s264_s16 = int_to_ptr.vmem [resolvable:$true] %s3198_s16 }
  0x1d   : > { %p3208_p13 = pneg %p3192_p11 }
  0x20   : > { %s2799_s19 = scalar_lea.hbm %s3836_s2, 3072 }
  0x21   : > { %p2800_p12 = scmp.ne.s32.totalorder %s3836_s2, %s2799_s19  ;;  %p2806_p5 = scmp.lt.u32.totalorder %s2799_s19, %s3836_s2 }
  0x23   : > { %p2802_p0 = pnand %p3208_p13, %p2800_p12 }
  0x25   : > { %p2803_p3 = pneg %p2802_p0 }
  0x27   : > { %p2808_p7 = pnand %p2806_p5, %p2803_p3 }
  0x29   : > { %2811 = shalt.err (!%p2808_p7)
}
  0x2a   : > { %s2812_s10 = scalar_lea.vmem %s3185_s11, 3072  ;;  %p2820_p2 = scmp.lt.s32.totalorder %s3185_s11, %s3185_s11 }
  0x2b   : > { %p2813_p9 = scmp.ne.s32.totalorder %s3185_s11, %s2812_s10  ;;  %p2821_p6 = scmp.lt.s32.totalorder %s2812_s10, %s2812_s10 }
  0x2d   : > { %p2815_p10 = pnand %p2813_p9, %p3208_p13  ;;  %p2822_p12 = por %p2821_p6, %p2820_p2 }
  0x2f   : > { %p2816_p1 = pneg %p2815_p10 }
  0x31   : > { %p2823_p0 = pnand %p2822_p12, %p2816_p1 }
  0x33   : > { %2826 = shalt.err (!%p2823_p0)
}
  0x34   : > { %s3090_s13 = smov 64   ;;  %s3091_s15 = smov 4  }
  0x35   : > { %2611 = dma.hbm_to_vmem [thread:$0]  (!%p3192_p11), %s3836_s2, 3072, %s3185_s11, [#allocation6], %s3090_s13, %s3090_s13, %s3091_s15  }
  0x36   : > { %s3838_s3 = sld [smem:[#allocation26_spill]] }
  0x3c   : > { %s2827_s21 = scalar_lea.hbm %s3838_s3, 1024 }
  0x3d   : > { %p2828_p1 = scmp.ne.s32.totalorder %s3838_s3, %s2827_s21  ;;  %p2834_p10 = scmp.lt.u32.totalorder %s2827_s21, %s3838_s3 }
  0x3f   : > { %p2830_p2 = pnand %p2828_p1, %p3208_p13 }
  0x41   : > { %p2831_p6 = pneg %p2830_p2 }
  0x43   : > { %p2836_p3 = pnand %p2834_p10, %p2831_p6 }
  0x45   : > { %2839 = shalt.err (!%p2836_p3)
}
  0x46   : > { %s2840_s11 = scalar_lea.vmem %s3196_s14, 1024  ;;  %p2848_p12 = scmp.lt.s32.totalorder %s3196_s14, %s3196_s14 }
  0x47   : > { %p2841_p5 = scmp.ne.s32.totalorder %s3196_s14, %s2840_s11  ;;  %p2849_p0 = scmp.lt.s32.totalorder %s2840_s11, %s2840_s11 }
  0x49   : > { %p2843_p7 = pnand %p2841_p5, %p3208_p13  ;;  %p2850_p1 = por %p2849_p0, %p2848_p12 }
  0x4b   : > { %p2844_p9 = pneg %p2843_p7 }
  0x4d   : > { %p2851_p2 = pnand %p2850_p1, %p2844_p9 }
  0x4f   : > { %2854 = shalt.err (!%p2851_p2)
}
  0x50   : > { %2614 = dma.hbm_to_vmem [thread:$0]  (!%p3192_p11), %s3838_s3, 1024, %s3196_s14, [#allocation9], %s3090_s13, %s3090_s13, %s3091_s15  }
  0x51   : > { %s2855_s20 = scalar_lea.hbm %s3819_s4, 1024 }
  0x52   : > { %p2856_p6 = scmp.ne.s32.totalorder %s3819_s4, %s2855_s20  ;;  %p2862_p5 = scmp.lt.u32.totalorder %s2855_s20, %s3819_s4 }
  0x54   : > { %p2858_p10 = pnand %p2856_p6, %p3208_p13 }
  0x56   : > { %p2859_p3 = pneg %p2858_p10 }
  0x58   : > { %p2864_p7 = pnand %p2862_p5, %p2859_p3 }
  0x5a   : > { %2867 = shalt.err (!%p2864_p7)
}
  0x5b   : > { %s2868_s11 = scalar_lea.vmem %s264_s16, 1024  ;;  %p2876_p1 = scmp.lt.s32.totalorder %s264_s16, %s264_s16 }
  0x5c   : > { %p2869_p9 = scmp.ne.s32.totalorder %s264_s16, %s2868_s11  ;;  %p2877_p2 = scmp.lt.s32.totalorder %s2868_s11, %s2868_s11 }
  0x5e   : > { %p2871_p12 = pnand %p2869_p9, %p3208_p13  ;;  %p2878_p4 = por %p2877_p2, %p2876_p1 }
  0x60   : > { %p2872_p0 = pneg %p2871_p12 }
  0x62   : > { %p2879_p8 = pnand %p2878_p4, %p2872_p0 }
  0x64   : > { %2882 = shalt.err (!%p2879_p8)
}
  0x65   : > { %2617 = dma.hbm_to_vmem [thread:$0]  (!%p3192_p11), %s3819_s4, 1024, %s264_s16, [#allocation9], %s3090_s13, %s3090_s13, %s3091_s15  }
  0x66   : > { %s3092_s17 = smov [#allocation11]   ;;  %s2883_s21 = scalar_lea.hbm %s3820_s5, 1024 }
  0x67   : > { %s276_s18 = sshll.u32 %s3092_s17, 4  ;;  %p2884_p4 = scmp.ne.s32.totalorder %s3820_s5, %s2883_s21  ;;  %s277_s18 = int_to_ptr.vmem [resolvable:$true] %s276_s18 }
  0x68   : > { %p2890_p10 = scmp.lt.u32.totalorder %s2883_s21, %s3820_s5 }
  0x69   : > { %p2886_p8 = pnand %p2884_p4, %p3208_p13 }
  0x6b   : > { %p2887_p6 = pneg %p2886_p8 }
  0x6d   : > { %p2892_p3 = pnand %p2890_p10, %p2887_p6 }
  0x6f   : > { %2895 = shalt.err (!%p2892_p3)
}
  0x70   : > { %s2896_s16 = scalar_lea.vmem %s277_s18, 1024  ;;  %p2904_p12 = scmp.lt.s32.totalorder %s277_s18, %s277_s18 }
  0x71   : > { %p2897_p5 = scmp.ne.s32.totalorder %s277_s18, %s2896_s16  ;;  %p2905_p0 = scmp.lt.s32.totalorder %s2896_s16, %s2896_s16 }
  0x73   : > { %p2899_p7 = pnand %p2897_p5, %p3208_p13  ;;  %p2906_p1 = por %p2905_p0, %p2904_p12 }
  0x75   : > { %p2900_p9 = pneg %p2899_p7 }
  0x77   : > { %p2907_p2 = pnand %p2906_p1, %p2900_p9 }
  0x79   : > { %2910 = shalt.err (!%p2907_p2)
}
  0x7a   : > { %2620 = dma.hbm_to_vmem [thread:$0]  (!%p3192_p11), %s3820_s5, 1024, %s277_s18, [#allocation12], %s3090_s13, %s3090_s13, %s3091_s15  }
  0x7b   : > { %s3302_s12 = sadd.s32 1, %s3085_s27   ;;  %s39_s22 = sadd.s32 1, %s3081_s26 }
  0x7c   : > { %s36_s17 = ssub.s32 %s3085_s27, %s3302_s12  ;;  %p46_p13 = scmp.ne.s32.totalorder %s3081_s26, %s3077_s25 }
  0x7d   : > { %p37_p4 = scmp.eq.s32.totalorder %s36_s17, 0  ;;  %p47_p8 = scmp.eq.s32.totalorder %s3085_s27, 0 }
  0x7e   : > { %p3839_p6 = scmp.eq.s32.totalorder %s3162_s28, 1  ;;  %p2639_p3 = scmp.lt.s32.totalorder %s3085_s27, 2 }
  0x7f   : > { %s3318_s20 = scalar_select %p37_p4, %s3081_s26, %s39_s22  }
  0x80   : > { %p3312_p10 = por %p3839_p6, %p46_p13  ;;  %p48_p5 = por %p47_p8, %p46_p13 }
  0x81   : > { %s290_s21 = sand.u32 1, %s3081_s26   ;;  %s3827_s15 = smul.u32 3072, %s3085_s27 }
  0x82   : > { %s3321_s13 = smul.u32 192, %s290_s21  ;;  %p3324_p11 = pnand %p2639_p3, %p48_p5 }
  0x83   : > { %s3842_s0 = sld [smem:[#allocation24_spill]]  ;;  %s312_s14 = sand.u32 1, %s3085_s27  }
  0x84   : > { %s294_s11 = scalar_lea.vmem [#allocation2], %s3321_s13  ;;  %s3339_s8 = scalar_lea.sflag [#allocation3], %s290_s21 }
  0x85   : > { %s302_s16 = sshll.u32 %s294_s11, 4  ;;  %p2913_p9 = pneg %p3324_p11  ;;  %s3336_s16 = int_to_ptr.vmem [resolvable:$true] %s302_s16 }
  0x89   : > { %s3333_s10 = scalar_lea.hbm %s3842_s0, %s3827_s15  ;;  %s2916_s29 = scalar_lea.hbm %s3842_s0, 6144 }
  0x8a   : > { %s2911_s22 = scalar_lea.hbm %s3333_s10, 3072  ;;  %p2917_p1 = scmp.lt.u32.totalorder %s3333_s10, %s3842_s0 }
  0x8b   : > { %p2912_p7 = scmp.ne.s32.totalorder %s3333_s10, %s2911_s22  ;;  %p2918_p2 = scmp.lt.u32.totalorder %s2916_s29, %s2911_s22 }
  0x8c   : > { %p2920_p4 = scmp.lt.u32.totalorder %s2911_s22, %s3333_s10 }
  0x8d   : > { %p2914_p12 = pnand %p2913_p9, %p2912_p7  ;;  %p2919_p13 = por %p2918_p2, %p2917_p1 }
  0x8f   : > { %p2915_p0 = pneg %p2914_p12  ;;  %p2921_p8 = por %p2920_p4, %p2919_p13 }
  0x91   : > { %p2922_p6 = pnand %p2921_p8, %p2915_p0 }
  0x93   : > { %2925 = shalt.err (!%p2922_p6)
}
  0x94   : > { %s2926_s21 = scalar_lea.vmem %s3336_s16, 3072  ;;  %s3093_s11 = smov [#allocation2]  }
  0x95   : > { %p2927_p3 = scmp.ne.s32.totalorder %s3336_s16, %s2926_s21  ;;  %s2931_s17 = sshll.u32 %s3093_s11, 4  ;;  %s2932_s17 = int_to_ptr.vmem [resolvable:$false] %s2931_s17 }
  0x96   : > { %s2933_s2 = scalar_lea.vmem %s2932_s17, 6144  ;;  %p2934_p12 = scmp.lt.s32.totalorder %s3336_s16, %s2932_s17 }
  0x97   : > { %p2929_p5 = pnand %p2927_p3, %p2913_p9  ;;  %p2935_p1 = scmp.lt.s32.totalorder %s2933_s2, %s2926_s21 }
  0x99   : > { %p2930_p7 = pneg %p2929_p5  ;;  %p2936_p2 = por %p2935_p1, %p2934_p12 }
  0x9b   : > { %p2937_p13 = pnand %p2936_p2, %p2930_p7 }
  0x9d   : > { %2940 = shalt.err (!%p2937_p13)
}
  0x9e   : > { %s3094_s15 = smov 192   ;;  %s3095_s22 = smov 12  }
  0x9f   : > { %2624 = dma.hbm_to_vmem [thread:$0]  (!%p3324_p11), %s3333_s10, 3072, %s3336_s16, %s3339_s8, %s3094_s15, %s3094_s15, %s3095_s22  }
  0xa0   : > { %s3843_s23 = smul.u32 3072, %s3085_s27  ;;  %s316_s17 = scalar_lea.vmem [#allocation5], %s3321_s13 }
  0xa1   : > { %s324_s2 = sshll.u32 %s316_s17, 4  ;;  %s3382_s0 = scalar_lea.sflag [#allocation6], %s312_s14  ;;  %s3378_s2 = int_to_ptr.vmem [resolvable:$true] %s324_s2 }
  0xa2   : > { %s3375_s11 = scalar_lea.hbm %s3816_s1, %s3843_s23  ;;  %s2946_s8 = scalar_lea.hbm %s3816_s1, 6144 }
  0xa3   : > { %s2941_s3 = scalar_lea.hbm %s3375_s11, 3072  ;;  %p2947_p6 = scmp.lt.u32.totalorder %s3375_s11, %s3816_s1 }
  0xa4   : > { %p2942_p0 = scmp.ne.s32.totalorder %s3375_s11, %s2941_s3  ;;  %p2948_p3 = scmp.lt.u32.totalorder %s2946_s8, %s2941_s3 }
  0xa5   : > { %p2950_p7 = scmp.lt.u32.totalorder %s2941_s3, %s3375_s11 }
  0xa6   : > { %p2944_p4 = pnand %p2942_p0, %p2913_p9  ;;  %p2949_p5 = por %p2948_p3, %p2947_p6 }
  0xa8   : > { %p2945_p8 = pneg %p2944_p4  ;;  %p2951_p12 = por %p2950_p7, %p2949_p5 }
  0xaa   : > { %p2952_p1 = pnand %p2951_p12, %p2945_p8 }
  0xac   : > { %2955 = shalt.err (!%p2952_p1)
}
  0xad   : > { %s2956_s13 = scalar_lea.vmem %s3378_s2, 3072  ;;  %s3096_s14 = smov [#allocation5]  }
  0xae   : > { %p2957_p2 = scmp.ne.s32.totalorder %s3378_s2, %s2956_s13  ;;  %s2961_s21 = sshll.u32 %s3096_s14, 4  ;;  %s2962_s21 = int_to_ptr.vmem [resolvable:$false] %s2961_s21 }
  0xaf   : > { %s2963_s17 = scalar_lea.vmem %s2962_s21, 6144  ;;  %p2964_p4 = scmp.lt.s32.totalorder %s3378_s2, %s2962_s21 }
  0xb0   : > { %p2959_p13 = pnand %p2957_p2, %p2913_p9  ;;  %p2965_p6 = scmp.lt.s32.totalorder %s2963_s17, %s2956_s13 }
  0xb2   : > { %p2960_p0 = pneg %p2959_p13  ;;  %p2966_p3 = por %p2965_p6, %p2964_p4 }
  0xb4   : > { %p2967_p5 = pnand %p2966_p3, %p2960_p0 }
  0xb6   : > { %2970 = shalt.err (!%p2967_p5)
}
  0xb7   : > { %2627 = dma.hbm_to_vmem [thread:$0]  (!%p3324_p11), %s3375_s11, 3072, %s3378_s2, %s3382_s0, %s3094_s15, %s3094_s15, %s3095_s22  }
  0xb8   : > { %p3844_p9 = scmp.ne.s32.totalorder %s3834_s9, 0 }
  0xb9   : > { %s3414_s3 = sand.u32 (!%p3844_p9), 1, %s3077_s25   ;;  %p3845_p8 = scmp.ne.s32.totalorder (!%p3844_p9), %s3831_s30, 0 }
  0xba   : > { %336 = sbr.rel (%p3844_p9) target bundleno = 1031 (0x407), region = 44  ;;  %s339_s16 = scalar_lea.sflag (!%p3844_p9), [#allocation3], %s3414_s3 }
  0xbb   : > { %s2583_s10 = smul.u32 (!%p3844_p9), 192, %s3414_s3 }
  0xbd   : > { %s3418_s8 = scalar_lea.vmem (!%p3844_p9), [#allocation2], %s2583_s10 }
  0xc1   : > { %3044 = dma.done.wait (%p3845_p8), %s339_s16, 3072  }
  0xc2   : > { %3046 = vsyncadd (%p3845_p8), %s339_s16, 4294964224  ;;  %s347_s0 = sand.u32 1, %s3162_s28   ;;  %s3425_s18 = scalar_lea.vmem [#allocation5], %s2583_s10 }
  0xc3   : > { %s348_s9 = scalar_lea.sflag [#allocation6], %s347_s0 }
  0xc4   : > { %3048 = dma.done.wait (%p3845_p8), %s348_s9, 3072  }
  0xc5   : > { %3050 = vsyncadd (%p3845_p8), %s348_s9, 4294964224  ;;  %p3846_p11 = scmp.eq.s32.totalorder %s3162_s28, 0 }
  0xc7   : > { %3052 = dma.done.wait (%p3846_p11), [#allocation6], 3072   ;;  %p3847_p7 = pmov %p3846_p11 }
  0xc9   : > { %3054 = vsyncadd (%p3847_p7), [#allocation6], 4294964224  ;;  %p3848_p12 = pmov %p3847_p7 }
  0xca   : > { %p3849_p1 = pmov %p3847_p7 }
  0xcb   : > { %3056 = dma.done.wait (%p3848_p12), [#allocation9], 2048  }
  0xcc   : > { %3058 = vsyncadd (%p3849_p1), [#allocation9], 4294965248  ;;  %p3850_p2 = pmov %p3849_p1 }
  0xcd   : > { %p3851_p13 = pmov %p3849_p1 }
  0xce   : > { %3060 = dma.done.wait (%p3850_p2), [#allocation12], 1024  }
  0xcf   : > { %3062 = vsyncadd (%p3851_p13), [#allocation12], 4294966272  ;;  %v2687_v0 = vld [vmem:[#allocation7 + $0x40] sm:$0xff]   ;;  %v3448_v3 = vld [vmem:[#allocation7 + $0x48] sm:$0xff]   ;;  %s2087_s30 = sshll.u32 %s3414_s3, 7  ;;  %s2193_s22 = sshll.u32 %s3162_s28, 11 }
  0xd0   : > { %v3443_v1 = vld [vmem:[#allocation7 + $0x80] sm:$0xff]   ;;  %2195 = vmatprep.subr.bf16.mxu0 %v2687_v0  ;;  %v3452_v4 = vld [vmem:[#allocation7 + $0x88] sm:$0xff]   ;;  %v3458_v6 = vld [vmem:[#allocation7 + $0x50] sm:$0xff]   ;;  %s3684_s15 = scalar_lea.vmem [#allocation13], %s2087_s30  ;;  %s3709_s29 = scalar_lea.hbm %s3821_s6, %s2193_s22 }
  0xd1   : > { %v3445_v2 = vld [vmem:[#allocation7] sm:$0xff]   ;;  %2403 = vmatprep.subr.bf16.mxu1 %v3443_v1  ;;  %v3455_v5 = vld [vmem:[#allocation7 + $0x8] sm:$0xff]   ;;  %v3460_v7 = vld [vmem:[#allocation7 + $0x90] sm:$0xff]   ;;  %s1887_s11 = sshll.u32 %s3684_s15, 4  ;;  %s1869_s13 = scalar_lea.sflag [#allocation4], %s3414_s3  ;;  %s3711_s11 = int_to_ptr.vmem [resolvable:$true] %s1887_s11 }
  0xd2   : > { %2196 = vmatpush3.bf16.msra.mxu0 %v3445_v2  ;;  %2404 = vmatpush3.bf16.msra.mxu1 %v3443_v1  ;;  %v3464_v8 = vld [vmem:[#allocation7 + $0x10] sm:$0xff]   ;;  %v3468_v9 = vld [vmem:[#allocation7 + $0x58] sm:$0xff]   ;;  %v3476_v12 = vld [vmem:[#allocation7 + $0x60] sm:$0xff]   ;;  %s2971_s14 = scalar_lea.vmem %s3711_s11, 2048  ;;  %s3097_s21 = smov [#allocation13]  }
  0xd3   : > { %2197 = vmatprep.subr.bf16.mxu0 %v3448_v3  ;;  %2405 = vmatprep.subr.bf16.mxu1 %v3452_v4  ;;  %v3470_v10 = vld [vmem:[#allocation7 + $0x98] sm:$0xff]   ;;  %v3480_v13 = vld [vmem:[#allocation7 + $0xa0] sm:$0xff]   ;;  %v3486_v15 = vld [vmem:[#allocation7 + $0x68] sm:$0xff]   ;;  %p2972_p0 = scmp.ne.s32.totalorder %s3711_s11, %s2971_s14  ;;  %s2975_s17 = sshll.u32 %s3097_s21, 4  ;;  %s2976_s17 = int_to_ptr.vmem [resolvable:$false] %s2975_s17 }
  0xd4   : > { %v3472_v11 = vld [vmem:[#allocation7 + $0x18] sm:$0xff]   ;;  %v3482_v14 = vld [vmem:[#allocation7 + $0x20] sm:$0xff]   ;;  %v3490_v16 = vld [vmem:[#allocation7 + $0xa8] sm:$0xff]   ;;  %s2977_s10 = scalar_lea.vmem %s2976_s17, 4096  ;;  %p2978_p3 = scmp.lt.s32.totalorder %s3711_s11, %s2976_s17 }
  0xd5   : > { %v3492_v17 = vld [vmem:[#allocation7 + $0x28] sm:$0xff]   ;;  %v3496_v18 = vld [vmem:[#allocation7 + $0x70] sm:$0xff]   ;;  %v3504_v21 = vld [vmem:[#allocation7 + $0x78] sm:$0xff]   ;;  %p2973_p4 = pnand %p2972_p0, %p3312_p10  ;;  %p2979_p5 = scmp.lt.s32.totalorder %s2977_s10, %s2971_s14 }
  0xd6   : > { %2198 = vmatpush3.bf16.msra.mxu0 %v3455_v5  ;;  %2406 = vmatpush3.bf16.msra.mxu1 %v3452_v4  ;;  %v3500_v19 = vld [vmem:[#allocation7 + $0xb0] sm:$0xff]   ;;  %v3508_v22 = vld [vmem:[#allocation7 + $0xb8] sm:$0xff]   ;;  %v2711_v26 = vld [vmem:[%s3418_s8] ss:$12 sps:$4 sm:$0xff]  }
  0xd7   : > { %2199 = vmatprep.subr.bf16.mxu0 %v3458_v6  ;;  %2407 = vmatprep.subr.bf16.mxu1 %v3460_v7  ;;  %v3502_v20 = vld [vmem:[#allocation7 + $0x30] sm:$0xff]   ;;  %v3516_v25 = vld [vmem:[#allocation7 + $0x38] sm:$0xff]   ;;  %v2715_v27 = vld [vmem:[%s3418_s8 + $0x20] ss:$12 sps:$4 sm:$0xff]   ;;  %p2974_p6 = pneg %p2973_p4  ;;  %p2980_p9 = por %p2979_p5, %p2978_p3 }
  0xd8   : > { %v2713_v23 = vld [vmem:[%s3418_s8 + $0x4] ss:$12 sps:$4 sm:$0xff]   ;;  %v2714_v24 = vld [vmem:[%s3418_s8 + $0x8] ss:$12 sps:$4 sm:$0xff]   ;;  %v2725_v35 = vld [vmem:[%s3418_s8 + $0x80] ss:$12 sps:$4 sm:$0xff]  }
  0xd9   : > { %797 = vmatprep.mubr.bf16.mxu0 %v2713_v23  ;;  %2419 = vmatprep.mubr.bf16.mxu1 %v2714_v24  ;;  %v2716_v28 = vld [vmem:[%s3418_s8 + $0x1c] ss:$12 sps:$4 sm:$0xff]   ;;  %v2718_v29 = vld [vmem:[%s3418_s8 + $0x38] ss:$12 sps:$4 sm:$0xff]   ;;  %v2721_v32 = vld [vmem:[%s3418_s8 + $0x34] ss:$12 sps:$4 sm:$0xff]   ;;  %p2981_p8 = pnand %p2980_p9, %p2974_p6 }
  0xda   : > { %2200 = vmatpush3.bf16.msra.mxu0 %v3464_v8  ;;  %2408 = vmatpush3.bf16.msra.mxu1 %v3460_v7  ;;  %v2719_v30 = vld [vmem:[%s3418_s8 + $0x18] ss:$12 sps:$4 sm:$0xff]   ;;  %v2720_v31 = vld [vmem:[%s3418_s8 + $0x50] ss:$12 sps:$4 sm:$0xff]   ;;  %v2723_v33 = vld [vmem:[%s3418_s8 + $0x68] ss:$12 sps:$4 sm:$0xff]  }
  0xdb   : > { %2201 = vmatprep.subr.bf16.mxu0 %v3468_v9  ;;  %2409 = vmatprep.subr.bf16.mxu1 %v3470_v10  ;;  %v2724_v34 = vld [vmem:[%s3418_s8 + $0x30] ss:$12 sps:$4 sm:$0xff]   ;;  %v2726_v36 = vld [vmem:[%s3418_s8 + $0x4c] ss:$12 sps:$4 sm:$0xff]   ;;  %v2729_v38 = vld [vmem:[%s3418_s8 + $0x48] ss:$12 sps:$4 sm:$0xff]  }
  0xdc   : > { %v2728_v37 = vld [vmem:[%s3418_s8 + $0x98] ss:$12 sps:$4 sm:$0xff]   ;;  %v2730_v39 = vld [vmem:[%s3418_s8 + $0xb0] ss:$12 sps:$4 sm:$0xff]   ;;  %v2733_v42 = vld [vmem:[%s3425_s18] ss:$12 sps:$4 sm:$0xff]  }
  0xdd   : > { %v2731_v40 = vld [vmem:[%s3418_s8 + $0x64] ss:$12 sps:$4 sm:$0xff]   ;;  %v2736_v43 = vld [vmem:[%s3418_s8 + $0x60] ss:$12 sps:$4 sm:$0xff]   ;;  %v2737_v44 = vld [vmem:[%s3418_s8 + $0x7c] ss:$12 sps:$4 sm:$0xff]  }
  0xde   : > { %2202 = vmatpush3.bf16.msra.mxu0 %v3472_v11  ;;  %2410 = vmatpush3.bf16.msra.mxu1 %v3470_v10  ;;  %v2735_v41 = vld [vmem:[%s3425_s18 + $0x4] ss:$12 sps:$4 sm:$0xff]   ;;  %v2739_v45 = vld [vmem:[%s3425_s18 + $0x1c] ss:$12 sps:$4 sm:$0xff]   ;;  %v2743_v48 = vld [vmem:[%s3418_s8 + $0x94] ss:$12 sps:$4 sm:$0xff]  }
  0xdf   : > { %2203 = vmatprep.subr.bf16.mxu0 %v3476_v12  ;;  %2411 = vmatprep.subr.bf16.mxu1 %v3480_v13  ;;  %v2741_v46 = vld [vmem:[%s3418_s8 + $0x78] ss:$12 sps:$4 sm:$0xff]   ;;  %v2745_v49 = vld [vmem:[%s3425_s18 + $0x34] ss:$12 sps:$4 sm:$0xff]   ;;  %v2747_v50 = vld [vmem:[%s3418_s8 + $0x90] ss:$12 sps:$4 sm:$0xff]  }
  0xe0   : > { %v2742_v47 = vld [vmem:[%s3425_s18 + $0x18] ss:$12 sps:$4 sm:$0xff]   ;;  %v2748_v51 = vld [vmem:[%s3425_s18 + $0x30] ss:$12 sps:$4 sm:$0xff]   ;;  %v2753_v54 = vld [vmem:[%s3418_s8 + $0xa8] ss:$12 sps:$4 sm:$0xff]  }
  0xe1   : > { %v2749_v52 = vld [vmem:[%s3418_s8 + $0xac] ss:$12 sps:$4 sm:$0xff]   ;;  %v2754_v55 = vld [vmem:[%s3425_s18 + $0x48] ss:$12 sps:$4 sm:$0xff]   ;;  %v2755_v56 = vld [vmem:[%s3425_s18 + $0x64] ss:$12 sps:$4 sm:$0xff]  }
  0xe2   : > { %2204 = vmatpush3.bf16.msra.mxu0 %v3482_v14  ;;  %2412 = vmatpush3.bf16.msra.mxu1 %v3480_v13  ;;  %v2751_v53 = vld [vmem:[%s3425_s18 + $0x4c] ss:$12 sps:$4 sm:$0xff]   ;;  %v2757_v57 = vld [vmem:[%s3425_s18 + $0x8] ss:$12 sps:$4 sm:$0xff]   ;;  %v2764_v63 = vld [vmem:[%s3425_s18 + $0x50] ss:$12 sps:$4 sm:$0xff]  }
  0xe3   : > { %2205 = vmatprep.subr.bf16.mxu0 %v3486_v15  ;;  %2413 = vmatprep.subr.bf16.mxu1 %v3490_v16  ;;  %v2758_v58 = vld [vmem:[%s3425_s18 + $0x60] ss:$12 sps:$4 sm:$0xff]   ;;  %v2760_v60 = vld [vmem:[%s3425_s18 + $0x7c] ss:$12 sps:$4 sm:$0xff]   ;;  %v2762_v61 = vld [vmem:[%s3425_s18 + $0x38] ss:$12 sps:$4 sm:$0xff]  }
  0xe4   : > { %v2759_v59 = vld [vmem:[%s3425_s18 + $0x20] ss:$12 sps:$4 sm:$0xff]   ;;  %v2763_v62 = vld [vmem:[%s3425_s18 + $0x78] ss:$12 sps:$4 sm:$0xff]  }
  0xe5   : > { %v2791_v24 = vld [vmem:[#allocation11] sm:$0xff]  }
  0xe6   : > { %2206 = vmatpush3.bf16.msra.mxu0 %v3492_v17  ;;  %2414 = vmatpush3.bf16.msra.mxu1 %v3490_v16 }
  0xe7   : > { %2207 = vmatprep.subr.bf16.mxu0 %v3496_v18  ;;  %2415 = vmatprep.subr.bf16.mxu1 %v3500_v19 }
  0xea   : > { %2208 = vmatpush3.bf16.msra.mxu0 %v3502_v20  ;;  %2416 = vmatpush3.bf16.msra.mxu1 %v3500_v19 }
  0xeb   : > { %2209 = vmatprep.subr.bf16.mxu0 %v3504_v21  ;;  %2417 = vmatprep.subr.bf16.mxu1 %v3508_v22 }
  0xee   : > { %2210 = vmatpush3.bf16.msra.mxu0 %v3516_v25  ;;  %2418 = vmatpush3.bf16.msra.mxu1 %v3508_v22 }
  0xef   : > { %2275 = vmatprep.subr.bf16.mxu1 %v2687_v0  ;;  %2435 = vmatprep.subr.bf16.mxu0 %v3443_v1  ;;  %v2765_v0 = vld [vmem:[%s3425_s18 + $0x94] ss:$12 sps:$4 sm:$0xff]  }
  0xf1   : > { %798 = vmatmul.mubr.bf16.vlgmr.msra.gmra.mrb[0].mxu0 %v2711_v26  ;;  %2420 = vmatmul.mubr.bf16.vlgmr.msra.gmra.mrb[0].mxu1 %v2715_v27 }
  0xf2   : > { %2276 = vmatpush3.bf16.msra.mxu1 %v3445_v2  ;;  %2436 = vmatpush3.bf16.msra.mxu0 %v3443_v1  ;;  %v2767_v1 = vld [vmem:[%s3425_s18 + $0x68] ss:$12 sps:$4 sm:$0xff]   ;;  %v2768_v2 = vld [vmem:[%s3425_s18 + $0x90] ss:$12 sps:$4 sm:$0xff]  }
  0xf3   : > { %2277 = vmatprep.subr.bf16.mxu1 %v3448_v3  ;;  %805 = vmatprep.mubr.bf16.mxu0 %v2716_v28  ;;  %v2769_v3 = vld [vmem:[%s3425_s18 + $0x80] ss:$12 sps:$4 sm:$0xff]  }
  0xf4   : > { %2423 = vmatprep.mubr.bf16.mxu1 %v2718_v29  ;;  %2437 = vmatprep.subr.bf16.mxu0 %v3452_v4 }
  0xf6   : > { %2278 = vmatpush3.bf16.msra.mxu1 %v3455_v5  ;;  %2438 = vmatpush3.bf16.msra.mxu0 %v3452_v4  ;;  %v2770_v4 = vld [vmem:[%s3425_s18 + $0xac] ss:$12 sps:$4 sm:$0xff]  }
  0xf7   : > { %2279 = vmatprep.subr.bf16.mxu1 %v3458_v6  ;;  %2439 = vmatprep.subr.bf16.mxu0 %v3460_v7  ;;  %v2772_v5 = vld [vmem:[%s3425_s18 + $0x98] ss:$12 sps:$4 sm:$0xff]   ;;  %v2773_v6 = vld [vmem:[%s3425_s18 + $0xa8] ss:$12 sps:$4 sm:$0xff]  }
  0xf9   : > { %806 = vmatmul.mubr.bf16.gmra.mrb[4].mxu0 %v2719_v30  ;;  %2424 = vmatmul.mubr.bf16.gmra.mrb[4].mxu1 %v2720_v31  ;;  %v2793_v31 = vld [vmem:[#allocation11 + $0x10] sm:$0xff]  }
  0xfa   : > { %2280 = vmatpush3.bf16.msra.mxu1 %v3464_v8  ;;  %813 = vmatprep.mubr.bf16.mxu0 %v2721_v32  ;;  %v2775_v8 = vld [vmem:[#allocation10] sm:$0xff]  }
  0xfb   : > { %2281 = vmatprep.subr.bf16.mxu1 %v3468_v9  ;;  %2427 = vmatprep.mubr.bf16.mxu1 %v2723_v33  ;;  %v2776_v9 = vld [vmem:[#allocation10 + $0x8] sm:$0xff]  }
  0xfc   : > { %2440 = vmatpush3.bf16.msra.mxu0 %v3460_v7  ;;  %v2774_v7 = vld [vmem:[%s3425_s18 + $0xb0] ss:$12 sps:$4 sm:$0xff]  }
  0xfd   : > { %2441 = vmatprep.subr.bf16.mxu0 %v3470_v10 }
  0xfe   : > { %2282 = vmatpush3.bf16.msra.mxu1 %v3472_v11  ;;  %v2778_v11 = vld [vmem:[#allocation10 + $0x18] sm:$0xff]  }
  0xff   : > { %2283 = vmatprep.subr.bf16.mxu1 %v3476_v12  ;;  %v2779_v12 = vld [vmem:[#allocation10 + $0x20] sm:$0xff]  }
 0x100   : > { %2442 = vmatpush3.bf16.msra.mxu0 %v3470_v10  ;;  %v2777_v10 = vld [vmem:[#allocation10 + $0x10] sm:$0xff]  }
 0x101   : > { %814 = vmatmul.mubr.bf16.gmra.mrb[8].mxu0 %v2724_v34  ;;  %2428 = vmatmul.mubr.bf16.gmra.mrb[8].mxu1 %v2725_v35 }
 0x102   : > { %2284 = vmatpush3.bf16.msra.mxu1 %v3482_v14  ;;  %821 = vmatprep.mubr.bf16.mxu0 %v2726_v36  ;;  %v2781_v14 = vld [vmem:[#allocation10 + $0x30] sm:$0xff]  }
 0x103   : > { %2285 = vmatprep.subr.bf16.mxu1 %v3486_v15  ;;  %2431 = vmatprep.mubr.bf16.mxu1 %v2728_v37  ;;  %v2782_v15 = vld [vmem:[#allocation10 + $0x38] sm:$0xff]  }
 0x104   : > { %2443 = vmatprep.subr.bf16.mxu0 %v3480_v13 }
 0x105   : > { %2444 = vmatpush3.bf16.msra.mxu0 %v3480_v13  ;;  %v2780_v13 = vld [vmem:[#allocation10 + $0x28] sm:$0xff]  }
 0x106   : > { %2286 = vmatpush3.bf16.msra.mxu1 %v3492_v17  ;;  %2445 = vmatprep.subr.bf16.mxu0 %v3490_v16 }
 0x107   : > { %2287 = vmatprep.subr.bf16.mxu1 %v3496_v18 }
 0x109   : > { %822 = vmatmul.mubr.bf16.gmra.mrb[12].mxu0 %v2729_v38  ;;  %2432 = vmatmul.mubr.bf16.gmra.mrb[12].mxu1 %v2730_v39 }
 0x10a   : > { %2288 = vmatpush3.bf16.msra.mxu1 %v3502_v20  ;;  %829 = vmatprep.mubr.bf16.mxu0 %v2731_v40  ;;  %v2794_v40 = vld [vmem:[#allocation11 + $0x18] sm:$0xff]  }
 0x10b   : > { %2289 = vmatprep.subr.bf16.mxu1 %v3504_v21  ;;  %1151 = vmatprep.mubr.bf16.mxu1 %v2735_v41 }
 0x10c   : > { %2446 = vmatpush3.bf16.msra.mxu0 %v3490_v16  ;;  %v3599_v16 = vld [vmem:[#allocation8] sm:$0xff]  }
 0x10d   : > { %2447 = vmatprep.subr.bf16.mxu0 %v3500_v19 }
 0x10e   : > { %2290 = vmatpush3.bf16.msra.mxu1 %v3516_v25  ;;  %v2792_v25 = vld [vmem:[#allocation11 + $0x8] sm:$0xff]  }
 0x10f   : > { %2531 = vmatprep.subr.bf16.mxu1 %v2791_v24 }
 0x110   : > { %2448 = vmatpush3.bf16.msra.mxu0 %v3500_v19 }
 0x111   : > { %830 = vmatmul.mubr.bf16.gmra.mrb[16].mxu0 %v2736_v43  ;;  %1152 = vmatmul.mubr.bf16.vlgmr.msra.gmra.mrb[16].mxu1 %v2733_v42 }
 0x112   : > { %837 = vmatprep.mubr.bf16.mxu0 %v2737_v44  ;;  %1159 = vmatprep.mubr.bf16.mxu1 %v2739_v45 }
 0x113   : > { %2449 = vmatprep.subr.bf16.mxu0 %v3508_v22  ;;  %2532 = vmatpush3.bf16.msra.mxu1 %v2791_v24 }
 0x114   : > { %2450 = vmatpush3.bf16.msra.mxu0 %v3508_v22  ;;  %2533 = vmatprep.subr.bf16.mxu1 %v2792_v25 }
 0x115   : > { %2467 = vmatprep.subr.bf16.mxu0 %v2775_v8 }
 0x117   : > { %2534 = vmatpush3.bf16.msra.mxu1 %v2792_v25 }
 0x118   : > { %2535 = vmatprep.subr.bf16.mxu1 %v2793_v31 }
 0x119   : > { %838 = vmatmul.mubr.bf16.gmra.mrb[20].mxu0 %v2741_v46  ;;  %1160 = vmatmul.mubr.bf16.gmra.mrb[20].mxu1 %v2742_v47  ;;  %v2795_v46 = vld [vmem:[#allocation11 + $0x20] sm:$0xff]  }
 0x11a   : > { %845 = vmatprep.mubr.bf16.mxu0 %v2743_v48  ;;  %1167 = vmatprep.mubr.bf16.mxu1 %v2745_v49 }
 0x11b   : > { %2536 = vmatpush3.bf16.msra.mxu1 %v2793_v31 }
 0x11c   : > { %2537 = vmatprep.subr.bf16.mxu1 %v2794_v40 }
 0x11f   : > { %2538 = vmatpush3.bf16.msra.mxu1 %v2794_v40 }
 0x120   : > { %2539 = vmatprep.subr.bf16.mxu1 %v2795_v46 }
 0x121   : > { %846 = vmatmul.mubr.bf16.gmra.mrb[24].mxu0 %v2747_v50  ;;  %1168 = vmatmul.mubr.bf16.gmra.mrb[24].mxu1 %v2748_v51 }
 0x122   : > { %853 = vmatprep.mubr.bf16.mxu0 %v2749_v52  ;;  %1175 = vmatprep.mubr.bf16.mxu1 %v2751_v53 }
 0x123   : > { %2540 = vmatpush3.bf16.msra.mxu1 %v2795_v46 }
 0x129   : > { %854 = vmatmul.mubr.bf16.gmra.mrb[28].mxu0 %v2753_v54  ;;  %1176 = vmatmul.mubr.bf16.gmra.mrb[28].mxu1 %v2754_v55  ;;  %v2796_v55 = vld [vmem:[#allocation11 + $0x28] sm:$0xff]  }
 0x12a   : > { %1183 = vmatprep.mubr.bf16.mxu1 %v2755_v56  ;;  %2451 = vmatprep.mubr.bf16.mxu0 %v2757_v57 }
 0x12b   : > { %2541 = vmatprep.subr.bf16.mxu1 %v2796_v55 }
 0x12c   : > { %2542 = vmatpush3.bf16.msra.mxu1 %v2796_v55 }
 0x131   : > { %1184 = vmatmul.mubr.bf16.gmra.mrb[32].mxu1 %v2758_v58  ;;  %2452 = vmatmul.mubr.bf16.vlgmr.msra.gmra.mrb[32].mxu0 %v2759_v59 }
 0x132   : > { %1191 = vmatprep.mubr.bf16.mxu1 %v2760_v60  ;;  %2455 = vmatprep.mubr.bf16.mxu0 %v2762_v61  ;;  %v2797_v61 = vld [vmem:[#allocation11 + $0x30] sm:$0xff]  }
 0x133   : > { %2468 = vmatpush3.bf16.msra.mxu0 %v2775_v8  ;;  %2543 = vmatprep.subr.bf16.mxu1 %v2797_v61 }
 0x134   : > { %2469 = vmatprep.subr.bf16.mxu0 %v2776_v9  ;;  %2544 = vmatpush3.bf16.msra.mxu1 %v2797_v61 }
 0x137   : > { %2470 = vmatpush3.bf16.msra.mxu0 %v2776_v9 }
 0x138   : > { %2471 = vmatprep.subr.bf16.mxu0 %v2777_v10 }
 0x139   : > { %1192 = vmatmul.mubr.bf16.gmra.mrb[36].mxu1 %v2763_v62  ;;  %2456 = vmatmul.mubr.bf16.gmra.mrb[36].mxu0 %v2764_v63 }
 0x13a   : > { %1199 = vmatprep.mubr.bf16.mxu1 %v2765_v0  ;;  %2459 = vmatprep.mubr.bf16.mxu0 %v2767_v1 }
 0x13b   : > { %2472 = vmatpush3.bf16.msra.mxu0 %v2777_v10 }
 0x13c   : > { %2473 = vmatprep.subr.bf16.mxu0 %v2778_v11 }
 0x13f   : > { %2474 = vmatpush3.bf16.msra.mxu0 %v2778_v11 }
 0x140   : > { %2475 = vmatprep.subr.bf16.mxu0 %v2779_v12 }
 0x141   : > { %1200 = vmatmul.mubr.bf16.gmra.mrb[40].mxu1 %v2768_v2  ;;  %2460 = vmatmul.mubr.bf16.gmra.mrb[40].mxu0 %v2769_v3 }
 0x142   : > { %1207 = vmatprep.mubr.bf16.mxu1 %v2770_v4  ;;  %2463 = vmatprep.mubr.bf16.mxu0 %v2772_v5 }
 0x143   : > { %2476 = vmatpush3.bf16.msra.mxu0 %v2779_v12 }
 0x144   : > { %2477 = vmatprep.subr.bf16.mxu0 %v2780_v13 }
 0x147   : > { %2478 = vmatpush3.bf16.msra.mxu0 %v2780_v13 }
 0x148   : > { %2479 = vmatprep.subr.bf16.mxu0 %v2781_v14 }
 0x149   : > { %1208 = vmatmul.mubr.bf16.gmra.mrb[44].mxu1 %v2773_v6  ;;  %2464 = vmatmul.mubr.bf16.gmra.mrb[44].mxu0 %v2774_v7 }
 0x14b   : > { %2480 = vmatpush3.bf16.msra.mxu0 %v2781_v14 }
 0x14c   : > { %2481 = vmatprep.subr.bf16.mxu0 %v2782_v15 }
 0x14f   : > { %2482 = vmatpush3.bf16.msra.mxu0 %v2782_v15 }
 0x150   : > { %2499 = vmatprep.subr.bf16.mxu0 %v3599_v16 }
 0x1c4   : > { %v2211_v17 = vpop.f32.mrb[0].mxu0  ;;  %v2421_v18 = vpop.f32.mrb[0].mxu1 }
 0x1c5   : > { %v2212_v19 = vpop.f32.mrb[1].mxu0  ;;  %v896_v20 = vpop.f32.mrb[1].mxu1 }
 0x1c6   : > { %v2213_v21 = vadd.f32 %v2212_v19, %v2211_v17  ;;  %v2214_v22 = vpop.f32.mrb[2].mxu0  ;;  %v2422_v23 = vpop.f32.mrb[2].mxu1 }
 0x1c7   : > { %v2215_v26 = vpop.f32.mrb[3].mxu0  ;;  %v899_v27 = vpop.f32.mrb[3].mxu1 }
 0x1c8   : > { %v3602_v28 = vadd.f32 %v2213_v21, %v896_v20  ;;  %v2216_v29 = vadd.f32 %v2215_v26, %v2214_v22 }
 0x1ca   : > { %v3604_v30 = vadd.f32 %v2216_v29, %v899_v27 }
 0x1cc   : > { %v1313_v32 = vpack.c.bf16 %v3604_v30, %v3602_v28  ;;  %v2217_v33 = vpop.f32.mrb[4].mxu0  ;;  %v2425_v34 = vpop.f32.mrb[4].mxu1  ;;  %v2798_v28 = vld [vmem:[#allocation11 + $0x38] sm:$0xff]  }
 0x1cd   : > { %v2218_v35 = vpop.f32.mrb[5].mxu0  ;;  %v912_v36 = vpop.f32.mrb[5].mxu1  ;;  %2545 = vmatprep.subr.bf16.mxu1 %v2798_v28 }
 0x1ce   : > { %v2219_v37 = vadd.f32 %v2218_v35, %v2217_v33  ;;  %v2220_v38 = vpop.f32.mrb[6].mxu0  ;;  %v2426_v39 = vpop.f32.mrb[6].mxu1  ;;  %2546 = vmatpush3.bf16.msra.mxu1 %v2798_v28 }
 0x1cf   : > { %v2221_v41 = vpop.f32.mrb[7].mxu0  ;;  %v915_v42 = vpop.f32.mrb[7].mxu1 }
 0x1d0   : > { %v3608_v43 = vadd.f32 %v2421_v18, %v2219_v37  ;;  %v2222_v44 = vadd.f32 %v2221_v41, %v2220_v38 }
 0x1d2   : > { %v3610_v45 = vadd.f32 %v2422_v23, %v2222_v44 }
 0x1d4   : > { %v1314_v47 = vpack.c.bf16 %v3610_v45, %v3608_v43  ;;  %v2223_v48 = vpop.f32.mrb[8].mxu0  ;;  %v2429_v49 = vpop.f32.mrb[8].mxu1 }
 0x1d5   : > { %v2224_v50 = vpop.f32.mrb[9].mxu0  ;;  %v928_v51 = vpop.f32.mrb[9].mxu1 }
 0x1d6   : > { %v2225_v52 = vadd.f32 %v2224_v50, %v2223_v48  ;;  %v2226_v53 = vpop.f32.mrb[10].mxu0  ;;  %v2430_v54 = vpop.f32.mrb[10].mxu1 }
 0x1d7   : > { %v2227_v56 = vpop.f32.mrb[11].mxu0  ;;  %v931_v57 = vpop.f32.mrb[11].mxu1 }
 0x1d8   : > { %v3614_v58 = vadd.f32 %v2225_v52, %v912_v36  ;;  %v2228_v59 = vadd.f32 %v2227_v56, %v2226_v53 }
 0x1da   : > { %v3616_v60 = vadd.f32 %v2228_v59, %v915_v42 }
 0x1dc   : > { %v2229_v62 = vpop.f32.mrb[12].mxu0  ;;  %v3618_v63 = vpop.f32.mrb[12].mxu1  ;;  %v1315_v0 = vpack.c.bf16 %v3616_v60, %v3614_v58 }
 0x1dd   : > { %v2230_v1 = vpop.f32.mrb[13].mxu0  ;;  %v944_v2 = vpop.f32.mrb[13].mxu1 }
 0x1de   : > { %v2231_v3 = vadd.f32 %v2230_v1, %v2229_v62  ;;  %v2232_v4 = vpop.f32.mrb[14].mxu0  ;;  %v3622_v5 = vpop.f32.mrb[14].mxu1 }
 0x1df   : > { %v2233_v6 = vpop.f32.mrb[15].mxu0  ;;  %v947_v7 = vpop.f32.mrb[15].mxu1 }
 0x1e0   : > { %v3624_v8 = vadd.f32 %v2425_v34, %v2231_v3  ;;  %v2234_v9 = vadd.f32 %v2233_v6, %v2232_v4 }
 0x1e2   : > { %v3626_v10 = vadd.f32 %v2426_v39, %v2234_v9 }
 0x1e4   : > { %v2235_v11 = vpop.f32.mrb[16].mxu0  ;;  %v2291_v12 = vpop.f32.mrb[16].mxu1  ;;  %v1316_v13 = vpack.c.bf16 %v3626_v10, %v3624_v8 }
 0x1e5   : > { %v2236_v14 = vpop.f32.mrb[17].mxu0  ;;  %v2292_v15 = vpop.f32.mrb[17].mxu1 }
 0x1e6   : > { %v2237_v17 = vadd.f32 %v2236_v14, %v2235_v11  ;;  %v2293_v18 = vadd.f32 %v2292_v15, %v2291_v12  ;;  %v2238_v19 = vpop.f32.mrb[18].mxu0  ;;  %v2294_v20 = vpop.f32.mrb[18].mxu1 }
 0x1e7   : > { %v2239_v21 = vpop.f32.mrb[19].mxu0  ;;  %v2295_v22 = vpop.f32.mrb[19].mxu1 }
 0x1e8   : > { %v3630_v23 = vadd.f32 %v2237_v17, %v928_v51  ;;  %v2240_v24 = vadd.f32 %v2239_v21, %v2238_v19  ;;  %v2296_v25 = vadd.f32 %v2295_v22, %v2294_v20 }
 0x1ea   : > { %v3632_v26 = vadd.f32 %v2240_v24, %v931_v57 }
 0x1ec   : > { %v2241_v27 = vpop.f32.mrb[20].mxu0  ;;  %v2297_v29 = vpop.f32.mrb[20].mxu1  ;;  %v1317_v31 = vpack.c.bf16 %v3632_v26, %v3630_v23 }
 0x1ed   : > { %v2242_v33 = vpop.f32.mrb[21].mxu0  ;;  %v2298_v34 = vpop.f32.mrb[21].mxu1 }
 0x1ee   : > { %v2243_v35 = vadd.f32 %v2242_v33, %v2241_v27  ;;  %v2299_v36 = vadd.f32 %v2298_v34, %v2297_v29  ;;  %v2244_v37 = vpop.f32.mrb[22].mxu0  ;;  %v2300_v38 = vpop.f32.mrb[22].mxu1 }
 0x1ef   : > { %v2245_v39 = vpop.f32.mrb[23].mxu0  ;;  %v2301_v40 = vpop.f32.mrb[23].mxu1 }
 0x1f0   : > { %v3636_v41 = vadd.f32 %v2429_v49, %v2243_v35  ;;  %v2246_v42 = vadd.f32 %v2245_v39, %v2244_v37  ;;  %v2302_v44 = vadd.f32 %v2301_v40, %v2300_v38 }
 0x1f2   : > { %v3638_v46 = vadd.f32 %v2430_v54, %v2246_v42 }
 0x1f4   : > { %v2247_v48 = vpop.f32.mrb[24].mxu0  ;;  %v2303_v50 = vpop.f32.mrb[24].mxu1  ;;  %v1318_v51 = vpack.c.bf16 %v3638_v46, %v3636_v41 }
 0x1f5   : > { %v2248_v52 = vpop.f32.mrb[25].mxu0  ;;  %v2304_v53 = vpop.f32.mrb[25].mxu1 }
 0x1f6   : > { %v2249_v55 = vadd.f32 %v2248_v52, %v2247_v48  ;;  %v2305_v56 = vadd.f32 %v2304_v53, %v2303_v50  ;;  %v2250_v57 = vpop.f32.mrb[26].mxu0  ;;  %v2306_v59 = vpop.f32.mrb[26].mxu1 }
 0x1f7   : > { %v2251_v61 = vpop.f32.mrb[27].mxu0  ;;  %v2307_v62 = vpop.f32.mrb[27].mxu1 }
 0x1f8   : > { %v3642_v1 = vadd.f32 %v2249_v55, %v944_v2  ;;  %v2252_v49 = vadd.f32 %v2251_v61, %v2250_v57  ;;  %v2308_v3 = vadd.f32 %v2307_v62, %v2306_v59  ;;  %v2784_v57 = vld [vmem:[#allocation8 + $0x8] sm:$0xff]  }
 0x1fa   : > { %v3644_v4 = vadd.f32 %v2252_v49, %v947_v7 }
 0x1fc   : > { %v2253_v54 = vpop.f32.mrb[28].mxu0  ;;  %v2309_v6 = vpop.f32.mrb[28].mxu1  ;;  %v1319_v9 = vpack.c.bf16 %v3644_v4, %v3642_v1 }
 0x1fd   : > { %v2254_v11 = vpop.f32.mrb[29].mxu0  ;;  %v2310_v12 = vpop.f32.mrb[29].mxu1 }
 0x1fe   : > { %v2255_v14 = vadd.f32 %v2254_v11, %v2253_v54  ;;  %v2311_v15 = vadd.f32 %v2310_v12, %v2309_v6  ;;  %v2256_v17 = vpop.f32.mrb[30].mxu0  ;;  %v2312_v19 = vpop.f32.mrb[30].mxu1 }
 0x1ff   : > { %v2257_v20 = vpop.f32.mrb[31].mxu0  ;;  %v2313_v21 = vpop.f32.mrb[31].mxu1 }
 0x200   : > { %v3649_v2 = vadd.f32 %v3618_v63, %v2255_v14  ;;  %v2258_v22 = vadd.f32 %v2257_v20, %v2256_v17  ;;  %v2314_v24 = vadd.f32 %v2313_v21, %v2312_v19 }
 0x202   : > { %v3652_v7 = vadd.f32 %v3622_v5, %v2258_v22 }
 0x204   : > { %v2315_v27 = vpop.f32.mrb[32].mxu1  ;;  %v2453_v29 = vpop.f32.mrb[32].mxu0  ;;  %v1320_v33 = vpack.c.bf16 %v3652_v7, %v3649_v2 }
 0x205   : > { %v1259_v34 = vadd.f32 %v2453_v29, %v2299_v36  ;;  %v2316_v35 = vpop.f32.mrb[33].mxu1  ;;  %v1250_v37 = vpop.f32.mrb[33].mxu0 }
 0x206   : > { %v2317_v38 = vadd.f32 %v2316_v35, %v2315_v27  ;;  %v1251_v39 = vadd.f32 %v2293_v18, %v1250_v37  ;;  %v2318_v40 = vpop.f32.mrb[34].mxu1  ;;  %v2454_v42 = vpop.f32.mrb[34].mxu0 }
 0x207   : > { %v1262_v48 = vadd.f32 %v2454_v42, %v2302_v44  ;;  %v2319_v63 = vpop.f32.mrb[35].mxu1  ;;  %v1253_v50 = vpop.f32.mrb[35].mxu0  ;;  %v2787_v42 = vld [vmem:[#allocation8 + $0x20] sm:$0xff]  }
 0x208   : > { %v2320_v52 = vadd.f32 %v2319_v63, %v2318_v40  ;;  %v1254_v53 = vadd.f32 %v2296_v25, %v1253_v50  ;;  %v2785_v25 = vld [vmem:[#allocation8 + $0x10] sm:$0xff]  }
 0x209   : > { %v1338_v55 = vpack.c.bf16 %v1262_v48, %v1259_v34 }
 0x20a   : > { %v1337_v5 = vpack.c.bf16 %v1254_v53, %v1251_v39 }
 0x20c   : > { %v2321_v59 = vpop.f32.mrb[36].mxu1  ;;  %v2457_v61 = vpop.f32.mrb[36].mxu0  ;;  %2483 = vmatprep.mubr.bf16.mxu0 %v1337_v5 }
 0x20d   : > { %v1275_v62 = vadd.f32 %v2457_v61, %v2311_v15  ;;  %v2322_v49 = vpop.f32.mrb[37].mxu1  ;;  %v1266_v36 = vpop.f32.mrb[37].mxu0  ;;  %2484 = vmatmul.mubr.bf16.vlgmr.msra.gmra.mrb[48].mxu0 %v1338_v55  ;;  %v2786_v15 = vld [vmem:[#allocation8 + $0x18] sm:$0xff]   ;;  %v2788_v55 = vld [vmem:[#allocation8 + $0x28] sm:$0xff]  }
 0x20e   : > { %v2323_v54 = vadd.f32 %v2322_v49, %v2321_v59  ;;  %v1267_v6 = vadd.f32 %v2305_v56, %v1266_v36  ;;  %v2324_v18 = vpop.f32.mrb[38].mxu1  ;;  %v2458_v11 = vpop.f32.mrb[38].mxu0  ;;  %2500 = vmatpush3.bf16.msra.mxu0 %v3599_v16 }
 0x20f   : > { %v1278_v44 = vadd.f32 %v2458_v11, %v2314_v24  ;;  %v2325_v12 = vpop.f32.mrb[39].mxu1  ;;  %v1269_v14 = vpop.f32.mrb[39].mxu0  ;;  %2501 = vmatprep.subr.bf16.mxu0 %v2784_v57 }
 0x210   : > { %v2326_v17 = vadd.f32 %v2325_v12, %v2324_v18  ;;  %v1270_v19 = vadd.f32 %v2308_v3, %v1269_v14 }
 0x211   : > { %v1340_v20 = vpack.c.bf16 %v1278_v44, %v1275_v62 }
 0x212   : > { %v1339_v21 = vpack.c.bf16 %v1270_v19, %v1267_v6  ;;  %2502 = vmatpush3.bf16.msra.mxu0 %v2784_v57 }
 0x213   : > { %2503 = vmatprep.subr.bf16.mxu0 %v2785_v25 }
 0x214   : > { %v2327_v22 = vpop.f32.mrb[40].mxu1  ;;  %v2461_v27 = vpop.f32.mrb[40].mxu0  ;;  %2487 = vmatprep.mubr.bf16.mxu0 %v1339_v21 }
 0x215   : > { %v1291_v56 = vadd.f32 %v2461_v27, %v2323_v54  ;;  %v2328_v29 = vpop.f32.mrb[41].mxu1  ;;  %v1282_v34 = vpop.f32.mrb[41].mxu0  ;;  %2488 = vmatmul.mubr.bf16.gmra.mrb[52].mxu0 %v1340_v20 }
 0x216   : > { %v2329_v16 = vadd.f32 %v2328_v29, %v2327_v22  ;;  %v1283_v24 = vadd.f32 %v2317_v38, %v1282_v34  ;;  %v2330_v35 = vpop.f32.mrb[42].mxu1  ;;  %v2462_v37 = vpop.f32.mrb[42].mxu0  ;;  %2504 = vmatpush3.bf16.msra.mxu0 %v2785_v25 }
 0x217   : > { %v1294_v39 = vadd.f32 %v2462_v37, %v2326_v17  ;;  %v2331_v40 = vpop.f32.mrb[43].mxu1  ;;  %v1285_v3 = vpop.f32.mrb[43].mxu0  ;;  %2505 = vmatprep.subr.bf16.mxu0 %v2786_v15  ;;  %v2790_v17 = vld [vmem:[#allocation8 + $0x38] sm:$0xff]  }
 0x218   : > { %v2332_v48 = vadd.f32 %v2331_v40, %v2330_v35  ;;  %v1286_v63 = vadd.f32 %v2320_v52, %v1285_v3  ;;  %v2789_v52 = vld [vmem:[#allocation8 + $0x30] sm:$0xff]  }
 0x219   : > { %v1342_v50 = vpack.c.bf16 %v1294_v39, %v1291_v56 }
 0x21a   : > { %v1341_v53 = vpack.c.bf16 %v1286_v63, %v1283_v24  ;;  %2506 = vmatpush3.bf16.msra.mxu0 %v2786_v15 }
 0x21b   : > { %2507 = vmatprep.subr.bf16.mxu0 %v2787_v42 }
 0x21c   : > { %v2333_v5 = vpop.f32.mrb[44].mxu1  ;;  %v2465_v57 = vpop.f32.mrb[44].mxu0  ;;  %2491 = vmatprep.mubr.bf16.mxu0 %v1341_v53 }
 0x21d   : > { %v2334_v59 = vpop.f32.mrb[45].mxu1  ;;  %v1298_v38 = vpop.f32.mrb[45].mxu0  ;;  %2492 = vmatmul.mubr.bf16.gmra.mrb[56].mxu0 %v1342_v50 }
 0x21e   : > { %v2335_v61 = vadd.f32 %v2334_v59, %v2333_v5  ;;  %v1299_v62 = vadd.f32 %v2329_v16, %v1298_v38  ;;  %v2336_v49 = vpop.f32.mrb[46].mxu1  ;;  %v2466_v36 = vpop.f32.mrb[46].mxu0  ;;  %2508 = vmatpush3.bf16.msra.mxu0 %v2787_v42 }
 0x21f   : > { %v2337_v54 = vpop.f32.mrb[47].mxu1  ;;  %v1301_v6 = vpop.f32.mrb[47].mxu0  ;;  %2509 = vmatprep.subr.bf16.mxu0 %v2788_v55 }
 0x220   : > { %v1307_v18 = vadd.f32 %v2465_v57, %v2335_v61  ;;  %v2338_v11 = vadd.f32 %v2337_v54, %v2336_v49  ;;  %v1302_v44 = vadd.f32 %v2332_v48, %v1301_v6 }
 0x222   : > { %v1310_v12 = vadd.f32 %v2466_v36, %v2338_v11  ;;  %v1343_v14 = vpack.c.bf16 %v1302_v44, %v1299_v62  ;;  %2510 = vmatpush3.bf16.msra.mxu0 %v2788_v55 }
 0x223   : > { %2511 = vmatprep.subr.bf16.mxu0 %v2789_v52 }
 0x224   : > { %2495 = vmatprep.mubr.bf16.mxu0 %v1343_v14  ;;  %v1344_v25 = vpack.c.bf16 %v1310_v12, %v1307_v18 }
 0x226   : > { %2496 = vmatmul.mubr.bf16.gmra.mrb[60].mxu0 %v1344_v25 }
 0x227   : > { %2512 = vmatpush3.bf16.msra.mxu0 %v2789_v52  ;;  %2515 = vmatprep.mubr.bf16.mxu0 %v1313_v32 }
 0x228   : > { %2513 = vmatprep.subr.bf16.mxu0 %v2790_v17 }
 0x22b   : > { %2514 = vmatpush3.bf16.msra.mxu0 %v2790_v17 }
 0x22e   : > { %2516 = vmatmul.mubr.bf16.vlgmr.msra.gmra.mrb[48].mxu0 %v1314_v47 }
 0x22f   : > { %2519 = vmatprep.mubr.bf16.mxu0 %v1315_v0 }
 0x236   : > { %2520 = vmatmul.mubr.bf16.gmra.mrb[52].mxu0 %v1316_v13 }
 0x237   : > { %2523 = vmatprep.mubr.bf16.mxu0 %v1317_v31 }
 0x23e   : > { %2524 = vmatmul.mubr.bf16.gmra.mrb[56].mxu0 %v1318_v51 }
 0x23f   : > { %2527 = vmatprep.mubr.bf16.mxu0 %v1319_v9 }
 0x246   : > { %2528 = vmatmul.mubr.bf16.gmra.mrb[60].mxu0 %v1320_v33 }
 0x301   : > { %v2517_v30 = vpop.f32.mrb[48].mxu0 }
 0x302   : > { %v1653_v32 = vmax.f32 %v2517_v30, 0.0  ;;  %v1588_v43 = vpop.f32.mrb[49].mxu0 }
 0x303   : > { %v1651_v45 = vmax.f32 %v1588_v43, 0.0  ;;  %v2518_v47 = vpop.f32.mrb[50].mxu0 }
 0x304   : > { %1669 = vst [vmem:[%s3684_s15 + $0x10] sm:$0xff] %v1653_v32  ;;  %v1654_v58 = vmax.f32 %v2518_v47, 0.0  ;;  %v1591_v60 = vpop.f32.mrb[51].mxu0 }
 0x305   : > { %1667 = vst [vmem:[%s3684_s15] sm:$0xff] %v1651_v45  ;;  %v1652_v0 = vmax.f32 %v1591_v60, 0.0 }
 0x306   : > { %1670 = vst [vmem:[%s3684_s15 + $0x18] sm:$0xff] %v1654_v58  ;;  %v1684_v8 = vpack.c.bf16 %v1654_v58, %v1653_v32 }
 0x307   : > { %1668 = vst [vmem:[%s3684_s15 + $0x8] sm:$0xff] %v1652_v0  ;;  %v1683_v10 = vpack.c.bf16 %v1652_v0, %v1651_v45 }
 0x309   : > { %v2521_v13 = vpop.f32.mrb[52].mxu0  ;;  %2547 = vmatprep.mubr.bf16.mxu1 %v1683_v10 }
 0x30a   : > { %v1657_v23 = vmax.f32 %v2521_v13, 0.0  ;;  %v1604_v26 = vpop.f32.mrb[53].mxu0  ;;  %2548 = vmatmul.mubr.bf16.vlgmr.msra.gmra.mrb[48].mxu1 %v1684_v8 }
 0x30b   : > { %v1655_v31 = vmax.f32 %v1604_v26, 0.0  ;;  %v2522_v41 = vpop.f32.mrb[54].mxu0 }
 0x30c   : > { %1673 = vst [vmem:[%s3684_s15 + $0x30] sm:$0xff] %v1657_v23  ;;  %v1658_v46 = vmax.f32 %v2522_v41, 0.0  ;;  %v1607_v51 = vpop.f32.mrb[55].mxu0 }
 0x30d   : > { %1671 = vst [vmem:[%s3684_s15 + $0x20] sm:$0xff] %v1655_v31  ;;  %v1656_v1 = vmax.f32 %v1607_v51, 0.0 }
 0x30e   : > { %1674 = vst [vmem:[%s3684_s15 + $0x38] sm:$0xff] %v1658_v46  ;;  %v1686_v4 = vpack.c.bf16 %v1658_v46, %v1657_v23 }
 0x30f   : > { %1672 = vst [vmem:[%s3684_s15 + $0x28] sm:$0xff] %v1656_v1  ;;  %v1685_v9 = vpack.c.bf16 %v1656_v1, %v1655_v31 }
 0x311   : > { %v2525_v2 = vpop.f32.mrb[56].mxu0  ;;  %2551 = vmatprep.mubr.bf16.mxu1 %v1685_v9 }
 0x312   : > { %v1661_v7 = vmax.f32 %v2525_v2, 0.0  ;;  %v1620_v33 = vpop.f32.mrb[57].mxu0  ;;  %2552 = vmatmul.mubr.bf16.gmra.mrb[52].mxu1 %v1686_v4 }
 0x313   : > { %v1659_v19 = vmax.f32 %v1620_v33, 0.0  ;;  %v2526_v20 = vpop.f32.mrb[58].mxu0 }
 0x314   : > { %1677 = vst [vmem:[%s3684_s15 + $0x50] sm:$0xff] %v1661_v7  ;;  %v1662_v21 = vmax.f32 %v2526_v20, 0.0  ;;  %v1623_v15 = vpop.f32.mrb[59].mxu0 }
 0x315   : > { %1675 = vst [vmem:[%s3684_s15 + $0x40] sm:$0xff] %v1659_v19  ;;  %v1660_v22 = vmax.f32 %v1623_v15, 0.0 }
 0x316   : > { %1678 = vst [vmem:[%s3684_s15 + $0x58] sm:$0xff] %v1662_v21  ;;  %v1688_v27 = vpack.c.bf16 %v1662_v21, %v1661_v7 }
 0x317   : > { %1676 = vst [vmem:[%s3684_s15 + $0x48] sm:$0xff] %v1660_v22  ;;  %v1687_v56 = vpack.c.bf16 %v1660_v22, %v1659_v19 }
 0x319   : > { %v2529_v29 = vpop.f32.mrb[60].mxu0  ;;  %2555 = vmatprep.mubr.bf16.mxu1 %v1687_v56 }
 0x31a   : > { %v1665_v34 = vmax.f32 %v2529_v29, 0.0  ;;  %v1636_v16 = vpop.f32.mrb[61].mxu0  ;;  %2556 = vmatmul.mubr.bf16.gmra.mrb[56].mxu1 %v1688_v27 }
 0x31b   : > { %v1663_v24 = vmax.f32 %v1636_v16, 0.0  ;;  %v2530_v35 = vpop.f32.mrb[62].mxu0 }
 0x31c   : > { %1681 = vst [vmem:[%s3684_s15 + $0x70] sm:$0xff] %v1665_v34  ;;  %v1666_v37 = vmax.f32 %v2530_v35, 0.0  ;;  %v1639_v39 = vpop.f32.mrb[63].mxu0 }
 0x31d   : > { %1679 = vst [vmem:[%s3684_s15 + $0x60] sm:$0xff] %v1663_v24  ;;  %v1664_v40 = vmax.f32 %v1639_v39, 0.0 }
 0x31e   : > { %1682 = vst [vmem:[%s3684_s15 + $0x78] sm:$0xff] %v1666_v37  ;;  %v1690_v3 = vpack.c.bf16 %v1666_v37, %v1665_v34 }
 0x31f   : > { %1680 = vst [vmem:[%s3684_s15 + $0x68] sm:$0xff] %v1664_v40  ;;  %v1689_v42 = vpack.c.bf16 %v1664_v40, %v1663_v24 }
 0x321   : > { %2559 = vmatprep.mubr.bf16.mxu1 %v1689_v42 }
 0x322   : > { %2560 = vmatmul.mubr.bf16.gmra.mrb[60].mxu1 %v1690_v3 }
 0x323   : > { %2984 = shalt.err (!%p2981_p8)
}
 0x324   : > { %s2985_s16 = scalar_lea.hbm %s3709_s29, 2048  ;;  %s2989_s9 = scalar_lea.hbm %s3821_s6, 4096 }
 0x325   : > { %p2986_p11 = scmp.ne.s32.totalorder %s3709_s29, %s2985_s16  ;;  %p2990_p1 = scmp.lt.u32.totalorder %s3709_s29, %s3821_s6 }
 0x326   : > { %p2991_p2 = scmp.lt.u32.totalorder %s2989_s9, %s2985_s16  ;;  %p2993_p0 = scmp.lt.u32.totalorder %s2985_s16, %s3709_s29 }
 0x327   : > { %p2987_p7 = pnand %p2986_p11, %p3312_p10 }
 0x328   : > { %p2992_p13 = por %p2991_p2, %p2990_p1 }
 0x329   : > { %p2988_p12 = pneg %p2987_p7 }
 0x32a   : > { %p2994_p4 = por %p2993_p0, %p2992_p13 }
 0x32c   : > { %p2995_p6 = pnand %p2994_p4, %p2988_p12 }
 0x32e   : > { %2998 = shalt.err (!%p2995_p6)
}
 0x32f   : > { %s3098_s2 = smov 128   ;;  %s3099_s23 = smov 8  }
 0x330   : > { %2604 = dma.vmem_to_hbm [thread:$0]  (%p3312_p10), %s3711_s11, 2048, %s3709_s29, %s1869_s13, %s3098_s2, %s3098_s2, %s3099_s23  }
 0x331   : > { %s3742_s14 = scalar_lea.vmem [#allocation14], %s2087_s30  ;;  %s3764_s13 = scalar_lea.hbm %s3822_s7, %s2193_s22 }
 0x332   : > { %s1903_s30 = sshll.u32 %s3742_s14, 4  ;;  %s1874_s21 = scalar_lea.sflag [#allocation15], %s3414_s3  ;;  %s3766_s30 = int_to_ptr.vmem [resolvable:$true] %s1903_s30 }
 0x333   : > { %s2999_s17 = scalar_lea.vmem %s3766_s30, 2048  ;;  %s3100_s28 = smov [#allocation14]  }
 0x334   : > { %p3000_p3 = scmp.ne.s32.totalorder %s3766_s30, %s2999_s17  ;;  %s3003_s10 = sshll.u32 %s3100_s28, 4  ;;  %s3004_s10 = int_to_ptr.vmem [resolvable:$false] %s3003_s10 }
 0x335   : > { %s3005_s16 = scalar_lea.vmem %s3004_s10, 4096  ;;  %p3006_p8 = scmp.lt.s32.totalorder %s3766_s30, %s3004_s10 }
 0x336   : > { %p3001_p5 = pnand %p3000_p3, %p3312_p10  ;;  %p3007_p11 = scmp.lt.s32.totalorder %s3005_s16, %s2999_s17 }
 0x338   : > { %p3002_p9 = pneg %p3001_p5  ;;  %p3008_p7 = por %p3007_p11, %p3006_p8 }
 0x33a   : > { %p3009_p12 = pnand %p3008_p7, %p3002_p9 }
 0x3dd   : > { %v2549_v48 = vpop.f32.mrb[48].mxu1 }
 0x3de   : > { %1854 = vst [vmem:[%s3742_s14 + $0x10] sm:$0xff] %v2549_v48  ;;  %v1789_v63 = vpop.f32.mrb[49].mxu1 }
 0x3df   : > { %1852 = vst [vmem:[%s3742_s14] sm:$0xff] %v1789_v63  ;;  %v2550_v50 = vpop.f32.mrb[50].mxu1 }
 0x3e0   : > { %1855 = vst [vmem:[%s3742_s14 + $0x18] sm:$0xff] %v2550_v50  ;;  %v1792_v53 = vpop.f32.mrb[51].mxu1 }
 0x3e1   : > { %1853 = vst [vmem:[%s3742_s14 + $0x8] sm:$0xff] %v1792_v53 }
 0x3e5   : > { %v2553_v55 = vpop.f32.mrb[52].mxu1 }
 0x3e6   : > { %1858 = vst [vmem:[%s3742_s14 + $0x30] sm:$0xff] %v2553_v55  ;;  %v1805_v5 = vpop.f32.mrb[53].mxu1 }
 0x3e7   : > { %1856 = vst [vmem:[%s3742_s14 + $0x20] sm:$0xff] %v1805_v5  ;;  %v2554_v57 = vpop.f32.mrb[54].mxu1 }
 0x3e8   : > { %1859 = vst [vmem:[%s3742_s14 + $0x38] sm:$0xff] %v2554_v57  ;;  %v1808_v59 = vpop.f32.mrb[55].mxu1 }
 0x3e9   : > { %1857 = vst [vmem:[%s3742_s14 + $0x28] sm:$0xff] %v1808_v59 }
 0x3ed   : > { %v2557_v38 = vpop.f32.mrb[56].mxu1 }
 0x3ee   : > { %1862 = vst [vmem:[%s3742_s14 + $0x50] sm:$0xff] %v2557_v38  ;;  %v1821_v61 = vpop.f32.mrb[57].mxu1 }
 0x3ef   : > { %1860 = vst [vmem:[%s3742_s14 + $0x40] sm:$0xff] %v1821_v61  ;;  %v2558_v62 = vpop.f32.mrb[58].mxu1 }
 0x3f0   : > { %1863 = vst [vmem:[%s3742_s14 + $0x58] sm:$0xff] %v2558_v62  ;;  %v1824_v49 = vpop.f32.mrb[59].mxu1 }
 0x3f1   : > { %1861 = vst [vmem:[%s3742_s14 + $0x48] sm:$0xff] %v1824_v49 }
 0x3f5   : > { %v2561_v36 = vpop.f32.mrb[60].mxu1 }
 0x3f6   : > { %1866 = vst [vmem:[%s3742_s14 + $0x70] sm:$0xff] %v2561_v36  ;;  %v1837_v54 = vpop.f32.mrb[61].mxu1 }
 0x3f7   : > { %1864 = vst [vmem:[%s3742_s14 + $0x60] sm:$0xff] %v1837_v54  ;;  %v2562_v6 = vpop.f32.mrb[62].mxu1 }
 0x3f8   : > { %1867 = vst [vmem:[%s3742_s14 + $0x78] sm:$0xff] %v2562_v6  ;;  %v1840_v52 = vpop.f32.mrb[63].mxu1 }
 0x3f9   : > { %1865 = vst [vmem:[%s3742_s14 + $0x68] sm:$0xff] %v1840_v52 }
 0x3fa   : > { %3012 = shalt.err (!%p3009_p12)
}
 0x3fb   : > { %s3013_s22 = scalar_lea.hbm %s3764_s13, 2048  ;;  %s3017_s9 = scalar_lea.hbm %s3822_s7, 4096 }
 0x3fc   : > { %p3014_p1 = scmp.ne.s32.totalorder %s3764_s13, %s3013_s22  ;;  %p3018_p0 = scmp.lt.u32.totalorder %s3764_s13, %s3822_s7 }
 0x3fd   : > { %p3019_p4 = scmp.lt.u32.totalorder %s3017_s9, %s3013_s22  ;;  %p3021_p3 = scmp.lt.u32.totalorder %s3013_s22, %s3764_s13 }
 0x3fe   : > { %p3015_p2 = pnand %p3014_p1, %p3312_p10 }
 0x3ff   : > { %p3020_p6 = por %p3019_p4, %p3018_p0 }
 0x400   : > { %p3016_p13 = pneg %p3015_p2 }
 0x401   : > { %p3022_p5 = por %p3021_p3, %p3020_p6 }
 0x403   : > { %p3023_p9 = pnand %p3022_p5, %p3016_p13 }
 0x405   : > { %3026 = shalt.err (!%p3023_p9)
}
 0x406   : > { %2605 = dma.vmem_to_hbm [thread:$0]  (%p3312_p10), %s3766_s30, 2048, %s3764_s13, %s1874_s21, %s3098_s2, %s3098_s2, %s3099_s23  }
 0x407 PF: > { %s3852_s14 = sld [smem:[#allocation23_spill]]  ;;  %s1918_s11 = sand.u32 1, %s3073_s24  }
 0x408   : > { %p3854_p11 = scmp.ge.s32.totalorder %s3085_s27, 2  ;;  %s1919_s29 = scalar_lea.sflag [#allocation4], %s1918_s11 }
 0x40d   : > { %p3853_p8 = scmp.ne.s32.totalorder %s3852_s14, 0 }
 0x40f   : > { %p2629_p7 = pnand %p3854_p11, %p3853_p8 }
 0x411   : > { %3064 = dma.done.wait (!%p2629_p7), %s1919_s29, 2048  }
 0x412   : > { %3066 = vsyncadd (!%p2629_p7), %s1919_s29, 4294965248  ;;  %s1928_s19 = scalar_lea.sflag [#allocation15], %s1918_s11 }
 0x413   : > { %3068 = dma.done.wait (!%p2629_p7), %s1928_s19, 2048  }
 0x414   : > { %3070 = vsyncadd (!%p2629_p7), %s1928_s19, 4294965248  ;;  %p29_p10 = scmp.ge.s32.totalorder %s3302_s12, 4   ;;  %s3855_s24 = smov %s3077_s25 }
 0x415   : > { %s3856_s25 = smov %s3081_s26  ;;  %s3857_s26 = smov %s3318_s20 }
 0x416   : > { %s3858_s27 = smov %s3302_s12  ;;  %31 = sbr.rel (!%p29_p10) target bundleno = 15 (0xf), region = 135 }
 0x41d   :  { %1933 = vsyncpa [#allocation3], 1 }
 0x41e   :  { %1935 = vsyncpa [#allocation3 + $0x1], 1 }
 0x41f   :  { %1936 = vsyncpa [#allocation6], 1 }
 0x420   :  { %1938 = vsyncpa [#allocation6 + $0x1], 1 }
 0x421   :  { %1939 = vsyncpa [#allocation9], 1 }
 0x422   :  { %1940 = vsyncpa [#allocation12], 1 }
 0x423   :  { %1941 = vsyncpa [#allocation4], 1 }
 0x424   :  { %1943 = vsyncpa [#allocation4 + $0x1], 1 }
 0x425   :  { %1944 = vsyncpa [#allocation15], 1 }
 0x426   :  { %1946 = vsyncpa [#allocation15 + $0x1], 1 }

</bundles_post_ra>
